<compile_context>
chip_gen: v5e
topology: v5e:2x2
jax: 0.10.0
libtpu: 0.0.40
codegen_flags: <defaults>
</compile_context>

<pallas_src>
import math

import jax
import jax.numpy as jnp
from jax import lax
from jax.experimental import pallas as pl
from jax.experimental.pallas import tpu as pltpu

EPS = 1e-4  # value PyTorch writes in place of zeros


def _division_kernel(xflat_ref, dblk_ref, o_ref):
    """Grid step i handles denominator channels [i*T, (i+1)*T).

    xflat_ref: (B, 1, 1, C*N)  full flattened input, resident across all steps
    dblk_ref:  (B, 1, T, N)    the T denominator channels of this step
    o_ref:     (B, 1, T, C*N)  output slab (row t = division by channel i*T + t)
    """
    i = pl.program_id(0)
    B = xflat_ref.shape[0]
    CN = xflat_ref.shape[-1]
    T, N = dblk_ref.shape[2], dblk_ref.shape[3]
    C = CN // N

    xf = xflat_ref[...]                               # (B,1,1,CN) raw input
    xc = jnp.where(xf == 0.0, EPS, xf)                # zero-cleaned copy (once per step)

    # Exact reciprocal of the cleaned denominator channels of this block.
    # (pl.reciprocal(..., approx=True) would be cheaper but ~1e-3 off the ref.)
    d = dblk_ref[...]                                 # (B,1,T,N)
    inv = 1.0 / jnp.where(d == 0.0, EPS, d)           # (B,1,T,N)

    # Numerator channel j has already been zero-cleaned (in-place in PyTorch)
    # iff j <= global denominator index.  In the flattened C*N lane space,
    # channel j occupies lanes [j*N, (j+1)*N), so "j <= i*T + t" is simply
    # "lane < (i*T + t + 1) * N" -- one cheap threshold compare per row.
    lane = lax.broadcasted_iota(jnp.int32, (1, 1, 1, CN), 3)     # (1,1,1,CN)
    row = lax.broadcasted_iota(jnp.int32, (1, 1, T, 1), 2)       # (1,1,T,1)
    thresh = (i * T + row + 1) * N                               # (1,1,T,1)
    num = jnp.where(lane < thresh, xc, xf)                       # (B,1,T,CN)

    # Tile each row's reciprocal across all C numerator channels along the lane
    # axis (equivalent to jnp.tile(inv, (1, 1, 1, C))), then a single multiply.
    scale = jnp.broadcast_to(inv[:, :, :, None, :],
                             (B, 1, T, C, N)).reshape(B, 1, T, CN)

    o_ref[...] = num * scale


def _pick_tile(c, cap=16):
    """Largest divisor of `c` that is <= cap (even blocks, parallel grid)."""
    for t in range(min(cap, c), 0, -1):
        if c % t == 0:
            return t
    return 1


def division(inputs, *, tile_i=None):
    """inputs: (B, 90, *spatial) float -> (B, 90*90, *spatial) float32."""
    B, C = inputs.shape[0], inputs.shape[1]
    assert C == 90, "module hardcodes repeat_interleave(90, dim=1)"
    spatial = inputs.shape[2:]
    N = int(math.prod(spatial)) if spatial else 1
    CN = C * N

    T = tile_i if tile_i is not None else _pick_tile(C)   # 15 for C=90
    assert C % T == 0
    G = C // T

    x = inputs.reshape(B, C, N).astype(jnp.float32)
    x_flat = x.reshape(B, 1, 1, CN)     # free reshape: lane-dense numerator view
    x_blk = x.reshape(B, G, T, N)       # free reshape: per-step denominator blocks

    out4 = pl.pallas_call(
        _division_kernel,
        out_shape=jax.ShapeDtypeStruct((B, G, T, CN), jnp.float32),
        grid=(G,),
        in_specs=[
            pl.BlockSpec((B, 1, 1, CN), lambda i: (0, 0, 0, 0)),   # resident input
            pl.BlockSpec((B, 1, T, N), lambda i: (0, i, 0, 0)),    # denominators
        ],
        out_specs=pl.BlockSpec((B, 1, T, CN), lambda i: (0, i, 0, 0)),
        compiler_params=pltpu.CompilerParams(
            dimension_semantics=("parallel",),
            vmem_limit_bytes=32 * 1024 * 1024,
        ),
        cost_estimate=pl.CostEstimate(
            flops=2 * B * C * C * N,                  # select + multiply per output elem
            transcendentals=0,
            bytes_accessed=4 * (2 * B * C * N + B * C * C * N),
        ),
    )(x_flat, x_blk)

    # (B, G, T, C*N) -> (B, C*C, *spatial): pure (free) reshape, no transpose.
    return out4.reshape((B, C * C) + spatial)


def division_ref(inputs):
    """Pure-JAX reference reproducing the PyTorch loop (incl. in-place view mutation)."""
    B, C = inputs.shape[0], inputs.shape[1]
    x = inputs.astype(jnp.float32)
    outs = []
    for i in range(C):
        xi = x[:, i:i + 1]
        xi = jnp.where(xi == 0.0, EPS, xi)
        x = x.at[:, i:i + 1].set(xi)          # mimics the in-place view write
        outs.append(x / xi)
    return jnp.concatenate(outs, axis=1)


if __name__ == "__main__":
    key = jax.random.PRNGKey(0)
    B, C, S = 2, 90, 16                       # channel dim must be 90
    x = jax.random.normal(key, (B, C, S), dtype=jnp.float32)
    # Plant some exact zeros to exercise the zero-replacement path.
    x = x.at[0, 3, :5].set(0.0)
    x = x.at[1, 0, :].set(0.0)
    x = x.at[1, 89, 7].set(0.0)

    out = division(x)
    out = jax.block_until_ready(out)

    ref = division_ref(x)
    assert out.shape == (B, C * C, S), out.shape
    max_err = float(jnp.max(jnp.abs(out - ref)))
    assert jnp.allclose(out, ref, rtol=1e-5, atol=1e-6), max_err

    print("KERNEL_OK")
</pallas_src>

<mosaic_0001>
module attributes {stable_mosaic.version = 11 : i64} {
  func.func @_division_kernel(%arg0: i32, %arg1: memref<2x1x1x1440xf32, #tpu.memory_space<vmem>>, %arg2: memref<2x1x15x16xf32, #tpu.memory_space<vmem>>, %arg3: memref<2x1x15x1440xf32, #tpu.memory_space<vmem>>) attributes {dimension_semantics = [#tpu.dimension_semantics<parallel>], iteration_bounds = array<i64: 6>, scalar_prefetch = 0 : i64, scratch_operands = 0 : i64, tpu.core_type = #tpu.core_type<tc>, window_params = [{pipeline_mode = #tpu.pipeline_mode<synchronous>, transform_indices = @transform_0, window_bounds = array<i64: 2, 1, 1, 1440>}, {transform_indices = @transform_1, window_bounds = array<i64: 2, 1, 15, 16>}, {transform_indices = @transform_2, window_bounds = array<i64: 2, 1, 15, 1440>}]} {
    %c0 = arith.constant 0 : index
    %c0_0 = arith.constant 0 : index
    %c0_1 = arith.constant 0 : index
    %c0_2 = arith.constant 0 : index
    %0 = vector.load %arg1[%c0, %c0_0, %c0_1, %c0_2] : memref<2x1x1x1440xf32, #tpu.memory_space<vmem>>, vector<2x1x1x1440xf32>
    %cst = arith.constant 0.000000e+00 : f32
    %1 = vector.broadcast %cst : f32 to vector<2x1x1x1440xf32>
    %2 = arith.cmpf oeq, %0, %1 : vector<2x1x1x1440xf32>
    %cst_3 = arith.constant 9.99999974E-5 : f32
    %3 = vector.broadcast %cst_3 : f32 to vector<2x1x1x1440xf32>
    %4 = arith.select %2, %3, %0 : vector<2x1x1x1440xi1>, vector<2x1x1x1440xf32>
    %c0_4 = arith.constant 0 : index
    %c0_5 = arith.constant 0 : index
    %c0_6 = arith.constant 0 : index
    %c0_7 = arith.constant 0 : index
    %5 = vector.load %arg2[%c0_4, %c0_5, %c0_6, %c0_7] : memref<2x1x15x16xf32, #tpu.memory_space<vmem>>, vector<2x1x15x16xf32>
    %cst_8 = arith.constant 0.000000e+00 : f32
    %6 = vector.broadcast %cst_8 : f32 to vector<2x1x15x16xf32>
    %7 = arith.cmpf oeq, %5, %6 : vector<2x1x15x16xf32>
    %cst_9 = arith.constant 9.99999974E-5 : f32
    %8 = vector.broadcast %cst_9 : f32 to vector<2x1x15x16xf32>
    %9 = arith.select %7, %8, %5 : vector<2x1x15x16xi1>, vector<2x1x15x16xf32>
    %cst_10 = arith.constant 1.000000e+00 : f32
    %10 = vector.broadcast %cst_10 : f32 to vector<2x1x15x16xf32>
    %11 = arith.divf %10, %9 : vector<2x1x15x16xf32>
    %12 = tpu.iota {dimensions = array<i32: 3>} : vector<1x1x1x1440xi32>
    %13 = tpu.iota {dimensions = array<i32: 2>} : vector<1x1x15x1xi32>
    %c15_i32 = arith.constant 15 : i32
    %14 = arith.muli %arg0, %c15_i32 : i32
    %15 = vector.broadcast %14 : i32 to vector<1x1x15x1xi32>
    %16 = arith.addi %15, %13 : vector<1x1x15x1xi32>
    %c1_i32 = arith.constant 1 : i32
    %17 = vector.broadcast %c1_i32 : i32 to vector<1x1x15x1xi32>
    %18 = arith.addi %16, %17 : vector<1x1x15x1xi32>
    %c16_i32 = arith.constant 16 : i32
    %19 = vector.broadcast %c16_i32 : i32 to vector<1x1x15x1xi32>
    %20 = arith.muli %18, %19 : vector<1x1x15x1xi32>
    %21 = vector.broadcast %12 : vector<1x1x1x1440xi32> to vector<1x1x15x1440xi32>
    %22 = vector.broadcast %20 : vector<1x1x15x1xi32> to vector<1x1x15x1440xi32>
    %23 = arith.cmpi slt, %21, %22 : vector<1x1x15x1440xi32>
    %24 = vector.shape_cast %23 : vector<1x1x15x1440xi1> to vector<1x1x15x1440xi1>
    %25 = vector.broadcast %24 : vector<1x1x15x1440xi1> to vector<2x1x15x1440xi1>
    %26 = vector.shape_cast %4 : vector<2x1x1x1440xf32> to vector<2x1x1x1440xf32>
    %27 = vector.broadcast %26 : vector<2x1x1x1440xf32> to vector<2x1x15x1440xf32>
    %28 = vector.shape_cast %0 : vector<2x1x1x1440xf32> to vector<2x1x1x1440xf32>
    %29 = vector.broadcast %28 : vector<2x1x1x1440xf32> to vector<2x1x15x1440xf32>
    %30 = arith.select %25, %27, %29 : vector<2x1x15x1440xi1>, vector<2x1x15x1440xf32>
    %31 = vector.shape_cast %11 : vector<2x1x15x16xf32> to vector<2x1x15x1x16xf32>
    %32 = vector.shape_cast %31 : vector<2x1x15x1x16xf32> to vector<2x1x15x1x16xf32>
    %33 = vector.broadcast %32 : vector<2x1x15x1x16xf32> to vector<2x1x15x90x16xf32>
    %34 = vector.shape_cast %33 : vector<2x1x15x90x16xf32> to vector<2x1x15x1440xf32>
    %35 = arith.mulf %30, %34 : vector<2x1x15x1440xf32>
    %c0_11 = arith.constant 0 : index
    %c0_12 = arith.constant 0 : index
    %c0_13 = arith.constant 0 : index
    %c0_14 = arith.constant 0 : index
    %36 = vector.load %arg3[%c0_11, %c0_12, %c0_13, %c0_14] : memref<2x1x15x1440xf32, #tpu.memory_space<vmem>>, vector<2x1x15x1440xf32>
    tpu.vector_store %arg3[%c0_11, %c0_12, %c0_13, %c0_14], %35 {strides = array<i32>} : memref<2x1x15x1440xf32, #tpu.memory_space<vmem>>, vector<2x1x15x1440xf32>,
    return
  }
  func.func @transform_0(%arg0: i32) -> (i32, i32, i32, i32) {
    %c0_i32 = arith.constant 0 : i32
    %c0_i32_0 = arith.constant 0 : i32
    %c0_i32_1 = arith.constant 0 : i32
    %c0_i32_2 = arith.constant 0 : i32
    %c0_i32_3 = arith.constant 0 : i32
    return %c0_i32, %c0_i32_0, %c0_i32_1, %c0_i32_2 : i32, i32, i32, i32
  }
  func.func @transform_1(%arg0: i32) -> (i32, i32, i32, i32) {
    %c0_i32 = arith.constant 0 : i32
    %c0_i32_0 = arith.constant 0 : i32
    %c0_i32_1 = arith.constant 0 : i32
    %c0_i32_2 = arith.constant 0 : i32
    return %c0_i32, %arg0, %c0_i32_0, %c0_i32_1 : i32, i32, i32, i32
  }
  func.func @transform_2(%arg0: i32) -> (i32, i32, i32, i32) {
    %c0_i32 = arith.constant 0 : i32
    %c0_i32_0 = arith.constant 0 : i32
    %c0_i32_1 = arith.constant 0 : i32
    %c0_i32_2 = arith.constant 0 : i32
    return %c0_i32, %arg0, %c0_i32_0, %c0_i32_1 : i32, i32, i32, i32
  }
}

</mosaic_0001>

<bundles_post_ra>
// kernel: tpu_custom_call.1
= control target key start
LH: loop header
LB: loop body
LE: loop exit
PB: predicated region body
PF: predicated region fallthrough
CT: control target
= control target key end

     0   :  { %7 = vsyncpa [#allocation3], 0  ;;  %s1685_s9 = smov 0   ;;  %s1687_s10 = smov 0   ;;  %s3038_s0 = inlined_call_operand.hbm [shape: f32[2,1,1,1440], index: 0, kind: input, shape index: {}]   ;;  %s3039_s1 = inlined_call_operand.vmem [shape: f32[2,6,15,16], index: 1, kind: input, shape index: {}]   ;;  %s3040_s2 = inlined_call_operand.vmem [shape: f32[2,6,15,1440], index: 2, kind: output, shape index: {}]  }
   0x1   :  { %s1689_s11 = smov 0  }
   0x2 LB: > { %s1701_s12 = sadd.s32 4294967295, %s1656_s11   ;;  %s1704_s13 = sadd.s32 1, %s1656_s11   ;;  %s1656_s11 = sphi %s1689_s11, %s3167_s11   ;;  %s1652_s10 = sphi %s1687_s10, %s3166_s10   ;;  %s1648_s9 = sphi %s1685_s9, %s3165_s9  }
   0x3   : > { %s38_s14 = ssub.s32 %s1656_s11, %s1704_s13  ;;  %s41_s15 = sadd.s32 1, %s1652_s10 }
   0x4   : > { %p39_p0 = scmp.eq.s32.totalorder %s38_s14, 0  ;;  %p48_p1 = scmp.ne.s32.totalorder %s1652_s10, %s1648_s9 }
   0x5   : > { %p49_p2 = scmp.eq.s32.totalorder %s1656_s11, 0  ;;  %p78_p3 = scmp.eq.s32.totalorder %s1701_s12, 5 }
   0x6   : > { %s1714_s16 = scalar_select %p39_p0, %s1652_s10, %s41_s15  }
   0x7   : > { %p1716_p4 = por %p49_p2, %p48_p1  ;;  %p1720_p5 = por %p78_p3, %p48_p1 }
   0x8   : > { %p1531_p6 = scmp.ge.s32.totalorder %s1656_s11, 1  ;;  %p91_p7 = scmp.lt.s32.totalorder %s1656_s11, 7 }
   0x9   : > { %p1554_p8 = scmp.eq.s32.totalorder %s1701_s12, 0  ;;  %s102_s22 = sshll.u32 %s3038_s0, 4  ;;  %s103_s22 = int_to_ptr.hbm [resolvable:$true] %s102_s22 }
   0xa   : > { %p1727_p9 = pnand %p1531_p6, %p91_p7  ;;  %s1658_s23 = smov [#allocation2]  }
   0xb   : > { %s104_s24 = sshll.u32 %s1658_s23, 4  ;;  %s1659_s25 = smov 192   ;;  %s105_s24 = int_to_ptr.vmem [resolvable:$true] %s104_s24 }
   0xc   : > { %p1550_p10 = pneg %p1727_p9  ;;  %s1660_s26 = smov 12  }
   0xd   : > { %p1533_p12 = scmp.ge.s32.totalorder %s1656_s11, 6 }
   0xe   : > { %p1551_p11 = pnand %p1554_p8, %p1550_p10 }
   0xf   : > { %114 = sbr.rel (%p1533_p12) target bundleno = 28 (0x1c), region = 20 }
  0x10   : > { %1553 = dma.hbm_to_vmem [thread:$0]  (!%p1551_p11), %s103_s22, 384, %s105_s24, [#allocation3], %s1659_s25, %s1659_s25, %s1660_s26  }
  0x14   : > { %117 = sbr.rel (!%p1716_p4) target bundleno = 28 (0x1c), region = 24  ;;  %s119_s27 = sand.u32 (%p1716_p4), 1, %s1652_s10  }
  0x15   : > { %s1543_s28 = sshll.u32 (%p1716_p4), %s1656_s11, 4  ;;  %s1534_s29 = sshll.u32 (%p1716_p4), %s119_s27, 5 }
  0x16   : > { %s124_s4 = scalar_lea.vmem (%p1716_p4), %s3039_s1, %s1543_s28  ;;  %s121_s5 = scalar_lea.vmem (%p1716_p4), [#allocation4], %s1534_s29 }
  0x17   : > { %v159_v0 = vld [vmem:[%s124_s4] sm:$0xff] (%p1716_p4)  ;;  %v161_v1 = vld [vmem:[%s124_s4 + $0x8] sm:$0xff] (%p1716_p4) }
  0x18   : > { %v163_v2 = vld [vmem:[%s124_s4 + $0x60] sm:$0xff] (%p1716_p4)  ;;  %160 = vst [vmem:[%s121_s5] sm:$0xff] (%p1716_p4), %v159_v0  ;;  %v165_v3 = vld [vmem:[%s124_s4 + $0x68] sm:$0xff] (%p1716_p4) }
  0x19   : > { %162 = vst [vmem:[%s121_s5 + $0x8] sm:$0xff] %v161_v1 }
  0x1a   : > { %164 = vst [vmem:[%s121_s5 + $0x10] sm:$0xff] %v163_v2 }
  0x1b   : > { %166 = vst [vmem:[%s121_s5 + $0x18] sm:$0xff] %v165_v3 }
  0x1c PF: > { %175 = sbr.rel (%p1727_p9) target bundleno = 358 (0x166), region = 62 }
  0x21   : > { %1643 = dma.done.wait (%p1554_p8), [#allocation3], 384  }
  0x22   : > { %1645 = vsyncadd (%p1554_p8), [#allocation3], 4294966912  ;;  %s183_s6 = sand.u32 1, %s1648_s9   ;;  %v1661_v15 = vmov 1983009808   ;;  %vm626_vm10 = vcmask 1047556  }
  0x23   : > { %s1539_s7 = sshll.u32 %s183_s6, 5  ;;  %v631_v16 = vunpack.c.l.s4 %v1661_v15  ;;  %v1662_v17 = vmov 1934713408   ;;  %s1663_s11 = smov 16  }
  0x24   : > { %s185_s8 = scalar_lea.vmem [#allocation4], %s1539_s7  ;;  %v679_v18 = vunpack.c.l.s4 %v1662_v17  ;;  %s1664_s14 = smov 32  }
  0x25   : > { %v217_v4 = vld [vmem:[%s185_s8 + $0x10] sm:$0xff]  ;;  %v215_v5 = vld [vmem:[%s185_s8] sm:$0xff]  ;;  %v218_v6 = vld [vmem:[%s185_s8 + $0x18] sm:$0x7f]  ;;  %v1777_v36 = vunpack.c.0.s8 %v631_v16  ;;  %s1665_s15 = smov 48   ;;  %s1666_s17 = smov 64  }
  0x26   : > { %vm221_vm0 = vcmp.eq.f32.partialorder %v217_v4, 0.0  ;;  %vm219_vm1 = vcmp.eq.f32.partialorder %v215_v5, 0.0  ;;  %vm222_vm2 = vcmp.eq.f32.partialorder %v218_v6, 0.0  ;;  %v216_v10 = vld [vmem:[%s185_s8 + $0x8] sm:$0x7f]  ;;  %v1784_v38 = vunpack.c.0.s8 %v679_v18  ;;  %s1667_s19 = smov 80  }
  0x27   : > { %v225_v7 = vsel %vm221_vm0, 0.0001, %v217_v4  ;;  %v223_v8 = vsel %vm219_vm1, 0.0001, %v215_v5  ;;  %v1755_v9 = vsel %vm222_vm2, 0.0001, %v218_v6 }
  0x28   : > { %1592 = vrcp.f32 %v225_v7  ;;  %vm220_vm3 = vcmp.eq.f32.partialorder %v216_v10, 0.0  ;;  %vm262_vm4 = vweird.f32 %v225_v7  ;;  %v266_v20 = vand.u32 2147483647, %v225_v7  ;;  %s1668_s20 = smov 96   ;;  %s1669_s21 = smov 112  }
  0x29   : > { %1594 = vrcp.f32 %v223_v8  ;;  %v1758_v11 = vsel %vm220_vm3, 0.0001, %v216_v10  ;;  %v268_v21 = vand.u32 2147483648, %v225_v7  ;;  %vm232_vm6 = vweird.f32 %v223_v8  ;;  %s303_s22 = smul.u32 15, %s1701_s12 }
  0x2a   : > { %1596 = vrcp.f32 %v1755_v9  ;;  %v236_v26 = vand.u32 2147483647, %v223_v8  ;;  %v238_v27 = vand.u32 2147483648, %v223_v8  ;;  %v283_v29 = vand.u32 2147483648, %v1755_v9  ;;  %s1544_s23 = smul.u32 384, %s183_s6 }
  0x2b   : > { %1598 = vrcp.f32 %v1758_v11  ;;  %v269_v31 = vor.u32 1.1754944e-38, %v268_v21  ;;  %vm267_vm9 = vcmp.eq.f32.partialorder %v266_v20, 8.507059e+37  ;;  %v281_v43 = vand.u32 2147483647, %v1755_v9  ;;  %s1545_s24 = smul.u32 (%p1720_p5), 192, %s1701_s12 }
  0x2c   : > { %vm1787_vm12 = vcmp.eq.f32.partialorder %v236_v26, 8.507059e+37  ;;  %v239_v41 = vor.u32 1.1754944e-38, %v238_v27  ;;  %v1794_v44 = vor.u32 1.1754944e-38, %v283_v29  ;;  %v253_v45 = vand.u32 2147483648, %v1758_v11  ;;  %s2436_s9 = scalar_lea.vmem [#allocation5], %s1544_s23 }
  0x2d   : > { %vm277_vm13 = vweird.f32 %v1755_v9  ;;  %vm1850_vm15 = vcmp.eq.f32.partialorder %v281_v43, 8.507059e+37  ;;  %vm247_vm0 = vweird.f32 %v1758_v11  ;;  %s2932_s27 = scalar_lea.vmem (%p1720_p5), %s3040_s2, %s1545_s24 }
  0x2e   : > { %v1593_v12 = vpop.eup %1592 }
  0x2f   : > { %v1760_v13 = vpop.eup %1594  ;;  %v258_v14 = vmul.f32 %v1593_v12, %v225_v7  ;;  %vm263_vm5 = vweird.f32 %v1593_v12 }
  0x30   : > { %v1763_v19 = vpop.eup %1596  ;;  %v228_v22 = vmul.f32 %v1760_v13, %v223_v8  ;;  %vm233_vm7 = vweird.f32 %v1760_v13  ;;  %vm1770_vm8 = vmor %vm262_vm4, %vm263_vm5 }
  0x31   : > { %v259_v23 = vsub.f32 1.0, %v258_v14  ;;  %v273_v24 = vmul.f32 %v1763_v19, %v1755_v9  ;;  %v1775_v34 = vpop.eup %1598  ;;  %vm1780_vm11 = vmor %vm232_vm6, %vm233_vm7  ;;  %vm278_vm14 = vweird.f32 %v1763_v19 }
  0x32   : > { %v229_v25 = vsub.f32 1.0, %v228_v22  ;;  %v1805_v49 = vmul.f32 %v1775_v34, %v1758_v11  ;;  %vm1912_vm1 = vmor %vm277_vm13, %vm278_vm14  ;;  %vm248_vm2 = vweird.f32 %v1775_v34 }
  0x33   : > { %v260_v28 = vmul.f32 %v1593_v12, %v259_v23  ;;  %v274_v33 = vsub.f32 1.0, %v273_v24  ;;  %vm1982_vm3 = vmor %vm247_vm0, %vm248_vm2  ;;  %vm1211_vm0 = vcmask 261120   ;;  %vm1221_vm2 = vcmask 523264  }
  0x34   : > { %v230_v32 = vmul.f32 %v1760_v13, %v229_v25 }
  0x35   : > { %v261_v35 = vadd.f32 %v1593_v12, %v260_v28  ;;  %v275_v48 = vmul.f32 %v1763_v19, %v274_v33 }
  0x36   : > { %v231_v39 = vadd.f32 %v1760_v13, %v230_v32 }
  0x37   : > { %v265_v42 = vsel %vm1770_vm8, %v1593_v12, %v261_v35  ;;  %v276_v25 = vadd.f32 %v1763_v19, %v275_v48 }
  0x38   : > { %v1797_v46 = vsel %vm267_vm9, %v269_v31, %v265_v42  ;;  %v235_v47 = vsel %vm1780_vm11, %v1760_v13, %v231_v39 }
  0x39   : > { %v552_v50 = vrot.slane %v1797_v46, 1  ;;  %v553_v51 = vrot.slane %v1797_v46, 2  ;;  %v554_v52 = vrot.slane %v1797_v46, 3  ;;  %v555_v53 = vrot.slane %v1797_v46, 4 }
  0x3a   : > { %v556_v54 = vrot.slane %v1797_v46, 5  ;;  %v557_v55 = vrot.slane %v1797_v46, 6  ;;  %v558_v56 = vrot.slane %v1797_v46, 7  ;;  %v3041_v57 = vperm.slane %v1797_v46, 0 }
  0x3b   : > { %v1815_v58 = vperm.slane %v552_v50, 0  ;;  %v1817_v59 = vperm.slane %v553_v51, 0  ;;  %v1819_v60 = vperm.slane %v554_v52, 0  ;;  %v1821_v61 = vperm.slane %v555_v53, 0 }
  0x3c   : > { %v1825_v62 = vperm.slane %v556_v54, 0  ;;  %v1827_v63 = vperm.slane %v557_v55, 0  ;;  %v1829_v0 = vperm.slane %v558_v56, 0  ;;  %v1833_v1 = vsel %vm1787_vm12, %v239_v41, %v235_v47 }
  0x3d   : > { %v856_v2 = vrot.slane %v1817_v59, 4  ;;  %v868_v3 = vrot.slane %v1819_v60, 4  ;;  %v539_v4 = vrot.slane %v1833_v1, 1  ;;  %v540_v5 = vrot.slane %v1833_v1, 2 }
  0x3e   : > { %v880_v6 = vrot.slane %v1827_v63, 4  ;;  %v892_v7 = vrot.slane %v1829_v0, 4  ;;  %v541_v8 = vrot.slane %v1833_v1, 3  ;;  %v542_v10 = vrot.slane %v1833_v1, 4 }
  0x3f   : > { %v857_v12 = vsel %vm626_vm10, %v856_v2, %v3041_v57  ;;  %v869_v13 = vsel %vm626_vm10, %v868_v3, %v1815_v58  ;;  %v543_v14 = vrot.slane %v1833_v1, 5  ;;  %v544_v15 = vrot.slane %v1833_v1, 6 }
  0x40   : > { %v1855_v17 = vperm.slane %v857_v12, %v1777_v36  ;;  %v1858_v18 = vperm.slane %v869_v13, %v1777_v36  ;;  %v881_v20 = vsel %vm626_vm10, %v880_v6, %v1821_v61  ;;  %v893_v21 = vsel %vm626_vm10, %v892_v7, %v1825_v62 }
  0x41   : > { %v1865_v22 = vperm.slane %v881_v20, %v1777_v36  ;;  %v1868_v23 = vperm.slane %v893_v21, %v1777_v36  ;;  %v545_v24 = vrot.slane %v1833_v1, 7  ;;  %v3044_v27 = vperm.slane %v1833_v1, 0 }
  0x42   : > { %v904_v26 = vrot.slane %v1858_v18, 4  ;;  %v1874_v28 = vperm.slane %v540_v5, 0  ;;  %v1876_v29 = vperm.slane %v541_v8, 0  ;;  %v1879_v31 = vperm.slane %v539_v4, 0 }
  0x43   : > { %v928_v30 = vrot.slane %v1868_v23, 4  ;;  %v1881_v32 = vperm.slane %v542_v10, 0  ;;  %v1883_v33 = vperm.slane %v543_v14, 0  ;;  %v1887_v37 = vperm.slane %v544_v15, 0 }
  0x44   : > { %v905_v35 = vsel %vm626_vm10, %v904_v26, %v1855_v17  ;;  %v1889_v39 = vperm.slane %v545_v24, 0  ;;  %v625_v40 = vrot.slane %v1874_v28, 4  ;;  %v638_v43 = vrot.slane %v1876_v29, 4 }
  0x45   : > { %v1894_v41 = vperm.slane %v905_v35, %v1784_v38  ;;  %v929_v42 = vsel %vm626_vm10, %v928_v30, %v1865_v22  ;;  %v244_v47 = vsub.f32 1.0, %v1805_v49  ;;  %v650_v51 = vrot.slane %v1887_v37, 4 }
  0x46   : > { %v1901_v48 = vperm.slane %v929_v42, %v1784_v38  ;;  %v627_v50 = vsel %vm626_vm10, %v625_v40, %v3044_v27  ;;  %v662_v52 = vrot.slane %v1889_v39, 4  ;;  %v639_v54 = vsel %vm626_vm10, %v638_v43, %v1879_v31 }
  0x47   : > { %v954_v49 = vrot.slane %v1894_v41, 4  ;;  %v251_v55 = vand.u32 2147483647, %v1758_v11  ;;  %v254_v56 = vor.u32 1.1754944e-38, %v253_v45  ;;  %v633_v2 = vperm.slane %v627_v50, %v1777_v36 }
  0x48   : > { %v645_v3 = vperm.slane %v639_v54, %v1777_v36  ;;  %v651_v9 = vsel %vm626_vm10, %v650_v51, %v1881_v32  ;;  %v663_v4 = vsel %vm626_vm10, %v662_v52, %v1883_v33  ;;  %v280_v45 = vsel %vm1912_vm1, %v1763_v19, %v276_v25 }
  0x49   : > { %v955_v5 = vsel %vm626_vm10, %v1901_v48, %v954_v49  ;;  %v1931_v6 = vperm.slane %v651_v9, %v1777_v36  ;;  %v1934_v7 = vperm.slane %v663_v4, %v1777_v36  ;;  %v1943_v10 = vsel %vm1850_vm15, %v1794_v44, %v280_v45 }
  0x4a   : > { %1094 = vrot.lane.b32.xlu1 %v955_v5, %s1663_s11  ;;  %v674_v8 = vrot.slane %v645_v3, 4  ;;  %v245_v12 = vmul.f32 %v1775_v34, %v244_v47  ;;  %v559_v14 = vrot.slane %v1943_v10, 1  ;;  %v560_v15 = vrot.slane %v1943_v10, 2 }
  0x4b   : > { %v698_v13 = vrot.slane %v1934_v7, 4  ;;  %v561_v19 = vrot.slane %v1943_v10, 3  ;;  %v562_v21 = vrot.slane %v1943_v10, 4  ;;  %v563_v16 = vrot.slane %v1943_v10, 5 }
  0x4c   : > { %v675_v20 = vsel %vm626_vm10, %v674_v8, %v633_v2  ;;  %v564_v44 = vrot.slane %v1943_v10, 6  ;;  %v3042_v26 = vperm.slane %v1943_v10, 0  ;;  %v1961_v30 = vperm.slane %v559_v14, 0 }
  0x4d   : > { %v1956_v24 = vperm.slane %v675_v20, %v1784_v38  ;;  %v699_v25 = vsel %vm626_vm10, %v698_v13, %v1931_v6  ;;  %v1966_v40 = vperm.slane %v560_v15, 0  ;;  %v1968_v42 = vperm.slane %v561_v19, 0 }
  0x4e   : > { %v1964_v35 = vperm.slane %v699_v25, %v1784_v38  ;;  %v1970_v43 = vperm.slane %v562_v21, 0  ;;  %v1973_v50 = vperm.slane %v563_v16, 0  ;;  %v1975_v51 = vperm.slane %v564_v44, 0 }
  0x4f   : > { %v724_v47 = vrot.slane %v1956_v24, 4  ;;  %v246_v52 = vadd.f32 %v1775_v34, %v245_v12  ;;  %v968_v49 = vrot.slane %v1966_v40, 4  ;;  %v980_v54 = vrot.slane %v1968_v42, 4 }
  0x50   : > { %vm1988_vm4 = vcmp.eq.f32.partialorder %v251_v55, 8.507059e+37  ;;  %v676_v4 = vrot.slane %v633_v2, 4  ;;  %v930_v5 = vrot.slane %v1865_v22, 4  ;;  %v992_v11 = vrot.slane %v1975_v51, 4 }
  0x51   : > { %v725_v45 = vsel %vm626_vm10, %v1964_v35, %v724_v47  ;;  %v1998_v8 = vperm.slane %v1973_v50, %v1777_v36  ;;  %v969_v55 = vsel %vm626_vm10, %v968_v49, %v3042_v26  ;;  %v981_v2 = vsel %vm626_vm10, %v980_v54, %v1961_v30 }
  0x52   : > { %1090 = vrot.lane.b32.xlu0 %v725_v45, %s1663_s11  ;;  %v250_v13 = vsel %vm1982_vm3, %v1775_v34, %v246_v52  ;;  %v975_v14 = vperm.slane %v969_v55, %v1777_v36  ;;  %v987_v15 = vperm.slane %v981_v2, %v1777_v36  ;;  %v993_v19 = vsel %vm626_vm10, %v992_v11, %v1970_v43 }
  0x53   : > { %v1038_v20 = vrot.slane %v1998_v8, 4  ;;  %v2016_v21 = vperm.slane %v993_v19, %v1777_v36  ;;  %v2020_v16 = vsel %vm1988_vm4, %v254_v56, %v250_v13  ;;  %v677_v44 = vsel %vm626_vm10, %v645_v3, %v676_v4 }
  0x54   : > { %v700_v34 = vrot.slane %v1931_v6, 4  ;;  %v1014_v25 = vrot.slane %v987_v15, 4  ;;  %v546_v47 = vrot.slane %v2020_v16, 1  ;;  %v547_v52 = vrot.slane %v2020_v16, 2 }
  0x55   : > { %v548_v53 = vrot.slane %v2020_v16, 3  ;;  %v1039_v49 = vsel %vm626_vm10, %v1038_v20, %v2016_v21  ;;  %v549_v54 = vrot.slane %v2020_v16, 4  ;;  %v550_v9 = vrot.slane %v2020_v16, 5 }
  0x56   : > { %v551_v56 = vrot.slane %v2020_v16, 6  ;;  %v1015_v3 = vsel %vm626_vm10, %v1014_v25, %v975_v14  ;;  %v2034_v6 = vperm.slane %v1039_v49, %v1784_v38  ;;  %v3045_v4 = vperm.slane %v2020_v16, 0 }
  0x57   : > { %v2038_v45 = vperm.slane %v677_v44, %v1784_v38  ;;  %v2041_v11 = vperm.slane %v1015_v3, %v1784_v38  ;;  %v2043_v55 = vperm.slane %v546_v47, 0  ;;  %v2045_v2 = vperm.slane %v547_v52, 0 }
  0x58   : > { %v2047_v13 = vperm.slane %v548_v53, 0  ;;  %v2049_v19 = vperm.slane %v549_v54, 0  ;;  %v2051_v20 = vperm.slane %v550_v9, 0  ;;  %v2053_v25 = vperm.slane %v551_v56, 0 }
  0x59   : > { %v701_v49 = vsel %vm626_vm10, %v1934_v7, %v700_v34  ;;  %v3043_v44 = vrot.slane %v2041_v11, 4  ;;  %v738_v3 = vrot.slane %v2045_v2, 4  ;;  %v1016_v9 = vrot.slane %v975_v14, 4 }
  0x5a   : > { %v750_v47 = vrot.slane %v2047_v13, 4  ;;  %v709_v52 = vperm.slane %v701_v49, %v1784_v38  ;;  %v762_v53 = vrot.slane %v2053_v25, 4  ;;  %v779_v54 = vperm.slane %v2051_v20, %v1777_v36 }
  0x5b   : > { %v906_v56 = vrot.slane %v1855_v17, 4  ;;  %v1065_v7 = vsel %vm626_vm10, %v2034_v6, %v3043_v44  ;;  %v739_v34 = vsel %vm626_vm10, %v738_v3, %v3045_v4  ;;  %v1017_v27 = vsel %vm626_vm10, %v987_v15, %v1016_v9 }
  0x5c   : > { %v751_v49 = vsel %vm626_vm10, %v750_v47, %v2043_v55  ;;  %v726_v57 = vrot.slane %v709_v52, 4  ;;  %1096 = vrot.lane.b32.xlu1 %v1065_v7, %s1663_s11  ;;  %v745_v26 = vperm.slane %v739_v34, %v1777_v36  ;;  %v763_v17 = vsel %vm626_vm10, %v762_v53, %v2049_v19 }
  0x5d   : > { %v757_v14 = vperm.slane %v751_v49, %v1777_v36  ;;  %v808_v12 = vrot.slane %v779_v54, 4  ;;  %v2080_v44 = vperm.slane %v763_v17, %v1777_v36  ;;  %v1040_v47 = vrot.slane %v2016_v21, 4 }
  0x5e   : > { %v727_v3 = vsel %vm626_vm10, %v726_v57, %v2038_v45  ;;  %v2088_v7 = vperm.slane %v1017_v27, %v1784_v38  ;;  %v907_v53 = vsel %vm626_vm10, %v1858_v18, %v906_v56  ;;  %v931_v34 = vsel %vm626_vm10, %v1868_v23, %v930_v5 }
  0x5f   : > { %v784_v4 = vrot.slane %v757_v14, 4  ;;  %1106 = vrot.lane.b32.xlu2 %v727_v3, %s1664_s14  ;;  %v809_v57 = vsel %vm626_vm10, %v808_v12, %v2080_v44  ;;  %v1041_v15 = vsel %vm626_vm10, %v1998_v8, %v1040_v47  ;;  %v915_v9 = vperm.slane %v907_v53, %v1784_v38 }
  0x60   : > { %v939_v49 = vperm.slane %v931_v34, %v1784_v38  ;;  %v2104_v17 = vperm.slane %v809_v57, %v1784_v38  ;;  %v2107_v18 = vperm.slane %v1041_v15, %v1784_v38  ;;  %v786_v22 = vrot.slane %v745_v26, 4 }
  0x61   : > { %v785_v27 = vsel %vm626_vm10, %v784_v4, %v745_v26  ;;  %v810_v12 = vrot.slane %v2080_v44, 4  ;;  %v958_v8 = vrot.slane %v915_v9, 4  ;;  %v664_v56 = vrot.slane %v1883_v33, 4 }
  0x62   : > { %v2110_v23 = vperm.slane %v785_v27, %v1784_v38  ;;  %v956_v5 = vrot.slane %v939_v49, 4  ;;  %v1066_v4 = vrot.slane %v2107_v18, 4  ;;  %v787_v47 = vsel %vm626_vm10, %v757_v14, %v786_v22 }
  0x63   : > { %v1004_v53 = vrot.slane %v1973_v50, 4  ;;  %v811_v26 = vsel %vm626_vm10, %v779_v54, %v810_v12  ;;  %v728_v57 = vrot.slane %v2038_v45, 4  ;;  %v795_v33 = vperm.slane %v787_v47, %v1784_v38 }
  0x64   : > { %v3046_v34 = vrot.slane %v2110_v23, 4  ;;  %v1067_v15 = vsel %vm626_vm10, %v1066_v4, %v2088_v7  ;;  %v957_v27 = vsel %vm626_vm10, %v956_v5, %v915_v9  ;;  %v819_v3 = vperm.slane %v811_v26, %v1784_v38 }
  0x65   : > { %1112 = vrot.lane.b32.xlu1 %v1067_v15, %s1664_s14  ;;  %v959_v54 = vsel %vm626_vm10, %v939_v49, %v958_v8  ;;  %v3091_v45 = vperm.slane %v2020_v16, 0  ;;  %v752_v12 = vrot.slane %v2043_v55, 4  ;;  %v764_v5 = vrot.slane %v2049_v19, 4 }
  0x66   : > { %v835_v14 = vsel %vm626_vm10, %v2104_v17, %v3046_v34  ;;  %v836_v9 = vrot.slane %v819_v3, 4  ;;  %v3092_v4 = vrot.slane %v2051_v20, 4  ;;  %v3093_v26 = vperm.slane %v1833_v1, 0 }
  0x67   : > { %v740_v22 = vrot.slane %v3091_v45, 4  ;;  %1092 = vrot.lane.b32.xlu0 %v835_v14, %s1663_s11  ;;  %v729_v15 = vsel %vm626_vm10, %v709_v52, %v728_v57  ;;  %v753_v55 = vsel %vm626_vm10, %v2047_v13, %v752_v12  ;;  %v765_v1 = vsel %vm626_vm10, %v2053_v25, %v764_v5 }
  0x68   : > { %v775_v47 = vsel %vm626_vm10, 0.0, %v3092_v4  ;;  %v628_v34 = vrot.slane %v3093_v26, 4  ;;  %v837_v19 = vsel %vm626_vm10, %v836_v9, %v795_v33  ;;  %v2155_v14 = vperm.slane %v753_v55, %v1777_v36 }
  0x69   : > { %v741_v16 = vsel %vm626_vm10, %v2045_v2, %v740_v22  ;;  %v2148_v49 = vperm.slane %v775_v47, %v1777_v36  ;;  %1108 = vrot.lane.b32.xlu2 %v837_v19, %s1664_s14  ;;  %v2161_v2 = vperm.slane %v765_v1, %v1777_v36  ;;  %v640_v57 = vrot.slane %v1879_v31, 4 }
  0x6a   : > { %v2152_v8 = vperm.slane %v741_v16, %v1777_v36  ;;  %v629_v52 = vsel %vm626_vm10, %v1874_v28, %v628_v34  ;;  %v796_v45 = vrot.slane %v2155_v14, 4  ;;  %v3094_v12 = vrot.slane %v1881_v32, 4 }
  0x6b   : > { %v820_v13 = vrot.slane %v2148_v49, 4  ;;  %v2169_v22 = vperm.slane %v629_v52, %v1777_v36  ;;  %v665_v9 = vsel %vm626_vm10, %v1889_v39, %v664_v56  ;;  %v641_v28 = vsel %vm626_vm10, %v1876_v29, %v640_v57 }
  0x6c   : > { %v653_v25 = vsel %vm626_vm10, %v1887_v37, %v3094_v12  ;;  %v2185_v34 = vperm.slane %v665_v9, %v1777_v36  ;;  %v797_v32 = vsel %vm626_vm10, %v796_v45, %v2152_v8  ;;  %v2193_v39 = vperm.slane %v641_v28, %v1777_v36 }
  0x6d   : > { %v821_v5 = vsel %vm626_vm10, %v820_v13, %v2161_v2  ;;  %v2182_v31 = vperm.slane %v653_v25, %v1777_v36  ;;  %v3095_v56 = vperm.slane %v1943_v10, 0  ;;  %1126 = vrot.lane.b32.xlu1 %v959_v54, %s1665_s15  ;;  %v838_v29 = vrot.slane %v795_v33, 4 }
  0x6e   : > { %v2190_v37 = vperm.slane %v821_v5, %v1784_v38  ;;  %v710_v47 = vrot.slane %v2185_v34, 4  ;;  %v982_v26 = vrot.slane %v1961_v30, 4  ;;  %v994_v16 = vrot.slane %v1970_v43, 4 }
  0x6f   : > { %v970_v4 = vrot.slane %v3095_v56, 4  ;;  %1110 = vrot.lane.b32.xlu0 %v957_v27, %s1664_s14  ;;  %v2203_v55 = vperm.slane %v797_v32, %v1784_v38  ;;  %v686_v10 = vrot.slane %v2193_v39, 4  ;;  %v1005_v54 = vsel %vm626_vm10, 0.0, %v1004_v53 }
  0x70   : > { %v840_v19 = vrot.slane %v2190_v37, 4  ;;  %v983_v33 = vsel %vm626_vm10, %v1968_v42, %v982_v26  ;;  %v711_v43 = vsel %vm626_vm10, %v710_v47, %v2182_v31  ;;  %v995_v13 = vsel %vm626_vm10, %v1975_v51, %v994_v16 }
  0x71   : > { %v687_v30 = vsel %vm626_vm10, %v686_v10, %v2169_v22  ;;  %v971_v27 = vsel %vm626_vm10, %v1966_v40, %v970_v4  ;;  %v2219_v1 = vperm.slane %v983_v33, %v1777_v36  ;;  %1122 = vrot.lane.b32.xlu2 %v729_v15, %s1665_s15  ;;  %v2225_v52 = vperm.slane %v1005_v54, %v1777_v36 }
  0x72   : > { %v1068_v42 = vrot.slane %v2088_v7, 4  ;;  %v839_v57 = vsel %vm626_vm10, %v819_v3, %v838_v29  ;;  %v841_v45 = vsel %vm626_vm10, %v840_v19, %v2203_v55  ;;  %v3096_v40 = vperm.slane %v1797_v46, 0 }
  0x73   : > { %v870_v25 = vrot.slane %v1815_v58, 4  ;;  %v693_v15 = vperm.slane %v687_v30, %v1784_v38  ;;  %v717_v9 = vperm.slane %v711_v43, %v1784_v38  ;;  %v2237_v51 = vperm.slane %v971_v27, %v1777_v36 }
  0x74   : > { %v858_v12 = vrot.slane %v3096_v40, 4  ;;  %v882_v5 = vrot.slane %v1821_v61, 4  ;;  %v2241_v7 = vperm.slane %v995_v13, %v1777_v36  ;;  %v1026_v3 = vrot.slane %v2219_v1, 4 }
  0x75   : > { %v1050_v28 = vrot.slane %v2225_v52, 4  ;;  %v871_v46 = vsel %vm626_vm10, %v1819_v60, %v870_v25  ;;  %1140 = vrot.lane.b32.xlu1 %v841_v45, %s1666_s17  ;;  %v732_v58 = vrot.slane %v693_v15, 4  ;;  %v1069_v32 = vsel %vm626_vm10, %v2107_v18, %v1068_v42 }
  0x76   : > { %v859_v61 = vsel %vm626_vm10, %v1817_v59, %v858_v12  ;;  %v879_v56 = vperm.slane %v871_v46, %v1777_v36  ;;  %v883_v4 = vsel %vm626_vm10, %v1827_v63, %v882_v5  ;;  %v894_v29 = vrot.slane %v1825_v62, 4 }
  0x77   : > { %1124 = vrot.lane.b32.xlu0 %v839_v57, %s1665_s15  ;;  %v730_v60 = vrot.slane %v717_v9, 4  ;;  %v1027_v47 = vsel %vm626_vm10, %v1026_v3, %v2237_v51  ;;  %v1051_v26 = vsel %vm626_vm10, %v1050_v28, %v2241_v7  ;;  %v867_v59 = vperm.slane %v859_v61, %v1777_v36 }
  0x78   : > { %v895_v18 = vsel %vm626_vm10, %v1829_v0, %v894_v29  ;;  %v891_v16 = vperm.slane %v883_v4, %v1777_v36  ;;  %v916_v19 = vrot.slane %v879_v56, 4  ;;  %v733_v62 = vsel %vm626_vm10, %v717_v9, %v732_v58 }
  0x79   : > { %1128 = vrot.lane.b32.xlu2 %v1069_v32, %s1665_s15  ;;  %v903_v63 = vperm.slane %v895_v18, %v1777_v36  ;;  %v731_v10 = vsel %vm626_vm10, %v730_v60, %v693_v15  ;;  %v1057_v54 = vperm.slane %v1051_v26, %v1784_v38  ;;  %v1033_v43 = vperm.slane %v1027_v47, %v1784_v38 }
  0x7a   : > { %v942_v30 = vrot.slane %v891_v16, 4  ;;  %v917_v0 = vsel %vm626_vm10, %v916_v19, %v867_v59  ;;  %v918_v57 = vrot.slane %v867_v59, 4  ;;  %v712_v25 = vrot.slane %v2182_v31, 4 }
  0x7b   : > { %v940_v33 = vrot.slane %v903_v63, 4  ;;  %v1072_v36 = vrot.slane %v1033_v43, 4  ;;  %v1070_v42 = vrot.slane %v1057_v54, 4  ;;  %v923_v40 = vperm.slane %v917_v0, %v1784_v38 }
  0x7c   : > { %v943_v45 = vsel %vm626_vm10, %v903_v63, %v942_v30  ;;  %v919_v28 = vsel %vm626_vm10, %v879_v56, %v918_v57  ;;  %v822_v46 = vrot.slane %v2161_v2, 4  ;;  %v842_v58 = vrot.slane %v2203_v55, 4 }
  0x7d   : > { %1154 = vrot.lane.b32.xlu1 %v733_v62, %s1667_s19  ;;  %v941_v27 = vsel %vm626_vm10, %v940_v33, %v891_v16  ;;  %v1073_v15 = vsel %vm626_vm10, %v1057_v54, %v1072_v36  ;;  %v951_v5 = vperm.slane %v943_v45, %v1784_v38  ;;  %v1071_v3 = vsel %vm626_vm10, %v1070_v42, %v1033_v43 }
  0x7e   : > { %v947_v13 = vperm.slane %v941_v27, %v1784_v38  ;;  %v798_v31 = vrot.slane %v2152_v8, 4  ;;  %v713_v32 = vsel %vm626_vm10, %v2185_v34, %v712_v25  ;;  %v927_v61 = vperm.slane %v919_v28, %v1784_v38 }
  0x7f   : > { %1138 = vrot.lane.b32.xlu0 %v731_v10, %s1666_s17  ;;  %v964_v4 = vrot.slane %v951_v5, 4  ;;  %v1078_v56 = vsel %vm626_vm10, %v1004_v53, %v2016_v21  ;;  %v962_v2 = vrot.slane %v923_v40, 4  ;;  %v688_v55 = vrot.slane %v2169_v22, 4 }
  0x80   : > { %v960_v12 = vrot.slane %v947_v13, 4  ;;  %v2299_v29 = vperm.slane %v1078_v56, %v1784_v38  ;;  %v823_v8 = vsel %vm626_vm10, %v2148_v49, %v822_v46  ;;  %v843_v34 = vsel %vm626_vm10, %v2190_v37, %v842_v58 }
  0x81   : > { %v721_v60 = vperm.slane %v713_v32, %v1784_v38  ;;  %v799_v47 = vsel %vm626_vm10, %v2155_v14, %v798_v31  ;;  %v1052_v50 = vrot.slane %v2241_v7, 4  ;;  %v3097_v21 = vrot.slane %v2041_v11, 4 }
  0x82   : > { %v961_v9 = vsel %vm626_vm10, %v960_v12, %v923_v40  ;;  %v965_v22 = vsel %vm626_vm10, %v964_v4, %v927_v61  ;;  %v963_v26 = vsel %vm626_vm10, %v947_v13, %v962_v2  ;;  %v831_v49 = vperm.slane %v823_v8, %v1784_v38  ;;  %v2349_v40 = vld [vmem:[#allocation2 + $0x14] sm:$0xf] }
  0x83   : > { %1142 = vrot.lane.b32.xlu2 %v961_v9, %s1666_s17  ;;  %v1085_v53 = vsel %vm626_vm10, %v2299_v29, %v3097_v21  ;;  %v689_v37 = vsel %vm626_vm10, %v2193_v39, %v688_v55  ;;  %v807_v14 = vperm.slane %v799_v47, %v1784_v38  ;;  %v734_v18 = vrot.slane %v721_v60, 4 }
  0x84   : > { %v1053_v7 = vsel %vm626_vm10, %v2225_v52, %v1052_v50  ;;  %v697_v16 = vperm.slane %v689_v37, %v1784_v38  ;;  %v844_v63 = vrot.slane %v831_v49, 4  ;;  %v1028_v19 = vrot.slane %v2237_v51, 4 }
  0x85   : > { %1160 = vrot.lane.b32.xlu1 %v1073_v15, %s1667_s19  ;;  %v846_v59 = vrot.slane %v807_v14, 4  ;;  %v1061_v39 = vperm.slane %v1053_v7, %v1784_v38  ;;  %v3098_v52 = vrot.slane %v2051_v20, 4  ;;  %v3099_v20 = vrot.slane %v2110_v23, 4  ;;  %v2351_v15 = vld [vmem:[#allocation2 + $0x8] sm:$0xf] }
  0x86   : > { %v735_v62 = vsel %vm626_vm10, %v734_v18, %v697_v16  ;;  %v845_v54 = vsel %vm626_vm10, %v844_v63, %v807_v14  ;;  %v1029_v30 = vsel %vm626_vm10, %v2219_v1, %v1028_v19  ;;  %v736_v27 = vrot.slane %v697_v16, 4 }
  0x87   : > { %1144 = vrot.lane.b32.xlu0 %v1071_v3, %s1666_s17  ;;  %v847_v10 = vsel %vm626_vm10, %v831_v49, %v846_v59  ;;  %v848_v33 = vsel %vm626_vm10, %v3098_v52, %v2080_v44  ;;  %v1074_v43 = vrot.slane %v1061_v39, 4  ;;  %v1037_v0 = vperm.slane %v1029_v30, %v1784_v38 }
  0x88   : > { %v2336_v51 = vperm.slane %v848_v33, %v1784_v38  ;;  %v737_v1 = vsel %vm626_vm10, %v721_v60, %v736_v27  ;;  %v966_v13 = vrot.slane %v927_v61, 4  ;;  %v287_v45 = vlaneseq }
  0x89   : > { %v1075_v36 = vsel %vm626_vm10, %v1074_v43, %v1037_v0  ;;  %v1076_v42 = vrot.slane %v1037_v0, 4  ;;  %v304_v25 = vstv %s303_s22  ;;  %vm210_vm5 = vcmp.eq.f32.partialorder %v2349_v40, 0.0 }
  0x8a   : > { %v855_v44 = vsel %vm626_vm10, %v2336_v51, %v3099_v20  ;;  %v967_v57 = vsel %vm626_vm10, %v951_v5, %v966_v13  ;;  %v301_v12 = vshrl.u32 %v287_v45, 7  ;;  %v2354_v9 = vand.u32 127, %v287_v45 }
  0x8b   : > { %1156 = vrot.lane.b32.xlu2 %v843_v34, %s1667_s19  ;;  %v1077_v38 = vsel %vm626_vm10, %v1061_v39, %v1076_v42  ;;  %v459_v5 = vperm.slane %v2349_v40, 0  ;;  %vm208_vm6 = vcmp.eq.f32.partialorder %v2351_v15, 0.0  ;;  %v2360_v58 = vsel %vm210_vm5, 0.0001, %v2349_v40 }
  0x8c   : > { %v302_v3 = vadd.s32 8, %v301_v12  ;;  %v305_v28 = vadd.s32 %v304_v25, %v301_v12  ;;  %v296_v46 = vadd.s32 1024, %v2354_v9  ;;  %v460_v31 = vperm.slane %v2349_v40, 1 }
  0x8d   : > { %1174 = vrot.lane.b32.xlu1 %v965_v22, %s1668_s20  ;;  %v461_v32 = vperm.slane %v2349_v40, 2  ;;  %v297_v61 = vadd.s32 1152, %v2354_v9  ;;  %v298_v4 = vadd.s32 1280, %v2354_v9  ;;  %v407_v55 = vperm.slane %v2360_v58, 0 }
  0x8e   : > { %v306_v56 = vadd.s32 %v304_v25, %v302_v3  ;;  %v307_v2 = vadd.s32 1, %v305_v28  ;;  %v408_v8 = vperm.slane %v2360_v58, 1  ;;  %v409_v34 = vperm.slane %v2360_v58, 2 }
  0x8f   : > { %1158 = vrot.lane.b32.xlu0 %v963_v26, %s1667_s19  ;;  %v2371_v60 = vsel %vm208_vm6, 0.0001, %v2351_v15  ;;  %v447_v21 = vperm.slane %v2351_v15, 0  ;;  %v448_v22 = vperm.slane %v2351_v15, 1  ;;  %v449_v37 = vperm.slane %v2351_v15, 2 }
  0x90   : > { %v308_v47 = vadd.s32 1, %v306_v56  ;;  %v2373_v50 = vmul.u32 16, %v307_v2  ;;  %v395_v26 = vperm.slane %v2371_v60, 0  ;;  %v397_v49 = vperm.slane %v2371_v60, 2 }
  0x91   : > { %v2410_v52 = vadd.s32 1408, %v2354_v9  ;;  %v952_v43 = vrot.slane %v1901_v48, 4  ;;  %v3049_v0 = vperm.slane %v2360_v58, 3  ;;  %v3050_v27 = vperm.slane %v2349_v40, 3 }
  0x92   : > { %v2381_v14 = vmul.u32 16, %v308_v47  ;;  %vm319_vm7 = vcmp.lt.s32.totalorder %v296_v46, %v2373_v50  ;;  %vm320_vm8 = vcmp.lt.s32.totalorder %v297_v61, %v2373_v50  ;;  %vm321_vm9 = vcmp.lt.s32.totalorder %v298_v4, %v2373_v50 }
  0x93   : > { %1170 = vrot.lane.b32.xlu2 %v735_v62, %s1668_s20  ;;  %v2386_v18 = vsel %vm319_vm7, %v407_v55, %v459_v5  ;;  %v2388_v7 = vsel %vm320_vm8, %v408_v8, %v460_v31  ;;  %v2390_v59 = vsel %vm321_vm9, %v409_v34, %v461_v32  ;;  %v2401_v62 = vsel %vm319_vm7, %v395_v26, %v447_v21 }
  0x94   : > { %vm331_vm11 = vcmp.lt.s32.totalorder %v296_v46, %v2381_v14  ;;  %vm332_vm12 = vcmp.lt.s32.totalorder %v297_v61, %v2381_v14  ;;  %vm333_vm13 = vcmp.lt.s32.totalorder %v298_v4, %v2381_v14  ;;  %vm322_vm14 = vcmp.lt.s32.totalorder %v2410_v52, %v2373_v50 }
  0x95   : > { %1188 = vrot.lane.b32.xlu1 %v847_v10, %s1669_s21  ;;  %v2395_v16 = vsel %vm331_vm11, %v407_v55, %v459_v5  ;;  %v2397_v63 = vsel %vm332_vm12, %v408_v8, %v460_v31  ;;  %v2399_v19 = vsel %vm333_vm13, %v409_v34, %v461_v32  ;;  %v2405_v10 = vsel %vm321_vm9, %v397_v49, %v449_v37 }
  0x96   : > { %3100 = vst [vmem:[#allocation7_spill] sm:$0xff] %v2397_v63  ;;  %v2414_v30 = vsel %vm333_vm13, %v397_v49, %v449_v37  ;;  %vm1206_vm15 = vcmask 130048   ;;  %v953_v20 = vsel %vm626_vm10, %v952_v43, %v1894_v41  ;;  %v522_v48 = vsel %vm322_vm14, %v3049_v0, %v3050_v27  ;;  %v2469_v43 = vld [vmem:[#allocation2 + $0xc] sm:$0xff] }
  0x97   : > { %1172 = vrot.lane.b32.xlu0 %v845_v54, %s1668_s20  ;;  %3101 = vst [vmem:[#allocation8_spill] sm:$0xff] %v2399_v19  ;;  %v2407_v54 = vsel %vm331_vm11, %v395_v26, %v447_v21  ;;  %v722_v13 = vrot.slane %v1964_v35, 4  ;;  %v1062_v5 = vrot.slane %v2034_v6, 4  ;;  %vm1216_vm1 = vcmask 392192  }
  0x98   : > { %v832_v4 = vrot.slane %v2104_v17, 4  ;;  %vm209_vm3 = vcmp.eq.f32.partialorder %v2469_v43, 0.0  ;;  %vm1226_vm4 = vcmask 654336   ;;  %vm311_vm5 = vcmp.lt.s32.totalorder %v2354_v9, %v2373_v50 }
  0x99   : > { %v723_v41 = vsel %vm626_vm10, %v722_v13, %v1956_v24  ;;  %v1063_v31 = vsel %vm626_vm10, %v1062_v5, %v2041_v11  ;;  %v2478_v13 = vadd.s32 128, %v2354_v9  ;;  %v2502_v5 = vsel %vm209_vm3, 0.0001, %v2469_v43 }
  0x9a   : > { %v833_v2 = vsel %vm626_vm10, %v832_v4, %v2110_v23  ;;  %v3071_v4 = vperm.slane %v2502_v5, 0  ;;  %vm1231_vm11 = vcmask 785408   ;;  %vm3073_vm3 = vcmp.lt.s32.totalorder %v2354_v9, %v2381_v14 }
  0x9b   : > { %1176 = vrot.lane.b32.xlu2 %v1075_v36, %s1668_s20  ;;  %vm312_vm6 = vcmp.lt.s32.totalorder %v2478_v13, %v2373_v50 }
  0x9d   : > { %1200 = vrot.lane.b32.xlu1 %v855_v44, %s1663_s11 }
  0x9f   : > { %1186 = vrot.lane.b32.xlu0 %v737_v1, %s1669_s21 }
  0xa3   : > { %1190 = vrot.lane.b32.xlu2 %v967_v57, %s1669_s21  ;;  %v3047_v57 = vperm.slane %v2371_v60, 3 }
  0xa7   : > { %1192 = vrot.lane.b32.xlu0 %v1077_v38, %s1669_s21  ;;  %v3048_v38 = vperm.slane %v2351_v15, 3 }
  0xa9   : > { %v498_v35 = vsel %vm322_vm14, %v3047_v57, %v3048_v38  ;;  %v3066_v57 = vperm.slane %v2469_v43, 5  ;;  %v3064_v38 = vperm.slane %v2469_v43, 6 }
  0xab   : > { %1202 = vrot.lane.b32.xlu2 %v1085_v53, %s1663_s11  ;;  %v396_v53 = vperm.slane %v2371_v60, 1 }
  0xad   : > { %v2403_v39 = vsel %vm320_vm8, %v396_v53, %v448_v22  ;;  %v2412_v33 = vsel %vm332_vm12, %v396_v53, %v448_v22 }
  0xb9   : > { %v1107_v36 = vpop.permute.xlu2 %1106 }
  0xbc   : > { %v1095_v44 = vpop.permute.xlu1 %1094 }
  0xbd   : > { %v1209_v1 = vsel %vm1206_vm15, %v953_v20, %v1095_v44 }
  0xbe   : > { %v1278_v42 = vmul.f32 %v1209_v1, %v522_v48 }
  0xc0   : > { %1327 = vst.msk [vmem:[%s2436_s9 + $0x118] sm:$0xff] %vm1211_vm0, %v1278_v42 }
  0xc3   : > { %v1109_v45 = vpop.permute.xlu2 %1108 }
  0xc4   : > { %v1091_v12 = vpop.permute.xlu0 %1090 }
  0xc5   : > { %v1207_v25 = vsel %vm1206_vm15, %v723_v41, %v1091_v12  ;;  %v2482_v41 = vadd.s32 256, %v2354_v9 }
  0xc6   : > { %v1254_v3 = vmul.f32 %v1207_v25, %v498_v35  ;;  %v1212_v28 = vsel %vm1211_vm0, %v1207_v25, %v1107_v36  ;;  %v2485_v35 = vadd.s32 384, %v2354_v9 }
  0xc7   : > { %vm3060_vm7 = vcmp.lt.s32.totalorder %v2482_v41, %v2373_v50 }
  0xc8   : > { %1302 = vst.msk [vmem:[%s2436_s9 + $0x58] sm:$0xff] %vm1211_vm0, %v1254_v3  ;;  %v2496_v3 = vadd.s32 640, %v2354_v9  ;;  %vm3058_vm8 = vcmp.lt.s32.totalorder %v2485_v35, %v2373_v50 }
  0xca   : > { %vm3055_vm12 = vcmp.lt.s32.totalorder %v2496_v3, %v2373_v50 }
  0xcb   : > { %v1123_v24 = vpop.permute.xlu2 %1122 }
  0xcc   : > { %v2455_v46 = vsel %vm1216_vm1, %v1212_v28, %v1123_v24  ;;  %v2499_v28 = vadd.s32 768, %v2354_v9 }
  0xce   : > { %v1097_v32 = vpop.permute.xlu1 %1096  ;;  %vm3056_vm13 = vcmp.lt.s32.totalorder %v2499_v28, %v2373_v50 }
  0xcf   : > { %v1210_v61 = vsel %vm1206_vm15, %v1063_v31, %v1097_v32  ;;  %v2506_v31 = vadd.s32 896, %v2354_v9 }
  0xd1   : > { %vm3059_vm14 = vcmp.lt.s32.totalorder %v2506_v31, %v2373_v50 }
  0xd3   : > { %v1129_v56 = vpop.permute.xlu2 %1128 }
  0xd7   : > { %v1113_v55 = vpop.permute.xlu1 %1112 }
  0xd8   : > { %v1215_v6 = vsel %vm1211_vm0, %v1210_v61, %v1113_v55  ;;  %v3052_v55 = vperm.slane %v2502_v5, 3 }
  0xd9   : > { %v1093_v8 = vpop.permute.xlu0 %1092  ;;  %v2466_v47 = vsel %vm1216_vm1, %v1215_v6, %v1129_v56  ;;  %v3051_v56 = vperm.slane %v2502_v5, 1  ;;  %v3065_v6 = vperm.slane %v2502_v5, 5 }
  0xda   : > { %v1208_v34 = vsel %vm1206_vm15, %v833_v2, %v1093_v8  ;;  %v3068_v2 = vperm.slane %v2502_v5, 2  ;;  %v3053_v8 = vperm.slane %v2502_v5, 4 }
  0xdb   : > { %v1213_v21 = vsel %vm1211_vm0, %v1208_v34, %v1109_v45  ;;  %v2488_v45 = vadd.s32 512, %v2354_v9  ;;  %v3072_v34 = vperm.slane %v2469_v43, 0 }
  0xdd   : > { %v1143_v22 = vpop.permute.xlu2 %1142  ;;  %vm3057_vm9 = vcmp.lt.s32.totalorder %v2488_v45, %v2373_v50  ;;  %v511_v27 = vsel %vm311_vm5, %v3071_v4, %v3072_v34 }
  0xdf   : > { %v1127_v26 = vpop.permute.xlu1 %1126 }
  0xe1   : > { %v1111_v53 = vpop.permute.xlu0 %1110 }
  0xe2   : > { %v1214_v20 = vsel %vm1211_vm0, %v1209_v1, %v1111_v53  ;;  %v3063_v53 = vperm.slane %v2502_v5, 6  ;;  %v3062_v1 = vperm.slane %v2469_v43, 7 }
  0xe3   : > { %v1219_v48 = vsel %vm1216_vm1, %v1214_v20, %v1127_v26  ;;  %v3054_v20 = vperm.slane %v2469_v43, 4 }
  0xe4   : > { %v2493_v25 = vsel %vm1221_vm2, %v1219_v48, %v1143_v22  ;;  %v2529_v22 = vld [vmem:[#allocation2] sm:$0xff] }
  0xe5   : > { %v1157_v49 = vpop.permute.xlu2 %1156  ;;  %vm207_vm0 = vcmp.eq.f32.partialorder %v2529_v22, 0.0 }
  0xe7   : > { %v1141_v17 = vpop.permute.xlu1 %1140 }
  0xe9   : > { %v1125_v37 = vpop.permute.xlu0 %1124 }
  0xea   : > { %v1218_v24 = vsel %vm1216_vm1, %v1213_v21, %v1125_v37  ;;  %v3070_v21 = vperm.slane %v2469_v43, 1  ;;  %v3067_v37 = vperm.slane %v2469_v43, 3  ;;  %vm1236_vm1 = vcmask 916480  }
  0xeb   : > { %v1223_v32 = vsel %vm1221_vm2, %v1218_v24, %v1141_v17  ;;  %v3069_v17 = vperm.slane %v2469_v43, 2  ;;  %v3061_v24 = vperm.slane %v2502_v5, 7 }
  0xec   : > { %v2551_v0 = vsel %vm1226_vm4, %v1223_v32, %v1157_v49  ;;  %v512_v12 = vsel %vm312_vm6, %v3051_v56, %v3070_v21  ;;  %v514_v56 = vsel %vm3058_vm8, %v3052_v55, %v3067_v37  ;;  %v517_v55 = vsel %vm3056_vm13, %v3063_v53, %v3064_v38 }
  0xed   : > { %v2471_v36 = vpop.permute.xlu2 %1170  ;;  %v513_v32 = vsel %vm3060_vm7, %v3068_v2, %v3069_v17  ;;  %vm325_vm13 = vcmp.lt.s32.totalorder %v2482_v41, %v2381_v14  ;;  %vm327_vm8 = vcmp.lt.s32.totalorder %v2488_v45, %v2381_v14  ;;  %vm330_vm7 = vcmp.lt.s32.totalorder %v2506_v31, %v2381_v14 }
  0xef   : > { %v2475_v44 = vpop.permute.xlu1 %1154 }
  0xf1   : > { %v1139_v42 = vpop.permute.xlu0 %1138 }
  0xf2   : > { %v2569_v49 = vsel %vm1221_vm2, %v2455_v46, %v1139_v42  ;;  %v515_v46 = vsel %vm3057_vm9, %v3053_v8, %v3054_v20  ;;  %v516_v42 = vsel %vm3055_vm12, %v3065_v6, %v3066_v57  ;;  %v518_v8 = vsel %vm3059_vm14, %v3061_v24, %v3062_v1 }
  0xf3   : > { %v2614_v20 = vsel %vm207_vm0, 0.0001, %v2529_v22  ;;  %vm324_vm12 = vcmp.lt.s32.totalorder %v2478_v13, %v2381_v14  ;;  %vm326_vm9 = vcmp.lt.s32.totalorder %v2485_v35, %v2381_v14  ;;  %vm328_vm14 = vcmp.lt.s32.totalorder %v2496_v3, %v2381_v14 }
  0xf4   : > { %vm329_vm0 = vcmp.lt.s32.totalorder %v2499_v28, %v2381_v14  ;;  %v3103_v6 = vperm.slane %v2614_v20, 0 }
  0xf5   : > { %v2519_v61 = vpop.permute.xlu2 %1176 }
  0xf7   : > { %v2531_v26 = vpop.permute.xlu1 %1160 }
  0xf9   : > { %v2537_v48 = vpop.permute.xlu0 %1144 }
  0xfd   : > { %v1191_v1 = vpop.permute.xlu2 %1190 }
  0xff   : > { %v1175_v24 = vpop.permute.xlu1 %1174 }
 0x101   : > { %v1159_v37 = vpop.permute.xlu0 %1158 }
 0x102   : > { %v1229_v34 = vsel %vm1226_vm4, %v2493_v25, %v1159_v37  ;;  %v3102_v37 = vperm.slane %v2529_v22, 0 }
 0x103   : > { %v1234_v57 = vsel %vm1231_vm11, %v1229_v34, %v1175_v24 }
 0x104   : > { %v1239_v4 = vsel %vm1236_vm1, %v1234_v57, %v1191_v1  ;;  %v499_v34 = vsel %vm3073_vm3, %v3103_v6, %v3102_v37  ;;  %vm334_vm3 = vcmp.lt.s32.totalorder %v2410_v52, %v2381_v14  ;;  %v3110_v6 = vrot.slane %v2299_v29, 4 }
 0x105   : > { %v1267_v24 = vmul.f32 %v1239_v4, %v511_v27  ;;  %v1268_v38 = vmul.f32 %v1239_v4, %v512_v12  ;;  %v1269_v53 = vmul.f32 %v1239_v4, %v513_v32  ;;  %v1270_v17 = vmul.f32 %v1239_v4, %v514_v56 }
 0x106   : > { %v1271_v2 = vmul.f32 %v1239_v4, %v515_v46  ;;  %v1272_v19 = vmul.f32 %v1239_v4, %v516_v42  ;;  %v1273_v57 = vmul.f32 %v1239_v4, %v517_v55  ;;  %v1274_v1 = vmul.f32 %v1239_v4, %v518_v8  ;;  %v1203_v46 = vpop.permute.xlu2 %1202 }
 0x107   : > { %v1275_v21 = vmul.f32 %v1239_v4, %v2386_v18  ;;  %v1276_v25 = vmul.f32 %v1239_v4, %v2388_v7  ;;  %v1277_v63 = vmul.f32 %v1239_v4, %v2390_v59  ;;  %1316 = vst [vmem:[%s2436_s9 + $0xc0] sm:$0xff] %v1267_v24  ;;  %v1189_v27 = vpop.permute.xlu1 %1188  ;;  %v3104_v12 = vperm.slane %v2529_v22, 1 }
 0x108   : > { %1317 = vst [vmem:[%s2436_s9 + $0xc8] sm:$0xff] %v1268_v38  ;;  %v3105_v56 = vperm.slane %v2614_v20, 1  ;;  %v3106_v18 = vperm.slane %v2529_v22, 2  ;;  %v3107_v7 = vperm.slane %v2614_v20, 2  ;;  %v3108_v4 = vperm.slane %v2529_v22, 3 }
 0x109   : > { %v3109_v38 = vperm.slane %v2614_v20, 3  ;;  %v1084_v32 = vsel %vm626_vm10, %v3110_v6, %v2041_v11  ;;  %v1173_v42 = vpop.permute.xlu0 %1172  ;;  %1318 = vst [vmem:[%s2436_s9 + $0xd0] sm:$0xff] %v1269_v53  ;;  %v3111_v37 = vperm.slane %v2529_v22, 4  ;;  %v3112_v24 = vperm.slane %v2614_v20, 4 }
 0x10a   : > { %v500_v55 = vsel %vm324_vm12, %v3105_v56, %v3104_v12  ;;  %v501_v59 = vsel %vm325_vm13, %v3107_v7, %v3106_v18  ;;  %v3113_v56 = vperm.slane %v2529_v22, 5  ;;  %v3114_v18 = vperm.slane %v2614_v20, 5  ;;  %1319 = vst [vmem:[%s2436_s9 + $0xd8] sm:$0xff] %v1270_v17 }
 0x10b   : > { %v502_v8 = vsel %vm326_vm9, %v3109_v38, %v3108_v4  ;;  %v503_v12 = vsel %vm327_vm8, %v3112_v24, %v3111_v37  ;;  %v3115_v29 = vperm.slane %v2349_v40, 3  ;;  %v3116_v53 = vperm.slane %v2360_v58, 3  ;;  %1320 = vst [vmem:[%s2436_s9 + $0xe0] sm:$0xff] %v1271_v2 }
 0x10c   : > { %v504_v11 = vsel %vm328_vm14, %v3114_v18, %v3113_v56  ;;  %v1242_v4 = vsel %vm1206_vm15, %v1084_v32, %v1203_v46  ;;  %v1233_v38 = vsel %vm1231_vm11, %v2551_v0, %v1173_v42  ;;  %v3117_v6 = vperm.slane %v2529_v22, 6  ;;  %1321 = vst [vmem:[%s2436_s9 + $0xe8] sm:$0xff] %v1272_v19 }
 0x10d   : > { %v534_v7 = vsel %vm334_vm3, %v3116_v53, %v3115_v29  ;;  %v3118_v37 = vperm.slane %v2614_v20, 6  ;;  %v3119_v58 = vperm.slane %v2529_v22, 7  ;;  %v3120_v24 = vperm.slane %v2614_v20, 7  ;;  %1322 = vst [vmem:[%s2436_s9 + $0xf0] sm:$0xff] %v1273_v57 }
 0x10e   : > { %v2731_v46 = vmul.f32 %v1242_v4, %v534_v7  ;;  %v1227_v0 = vsel %vm1226_vm4, %v2569_v49, %v2475_v44  ;;  %v1238_v17 = vsel %vm1236_vm1, %v1233_v38, %v1189_v27  ;;  %1323 = vst [vmem:[%s2436_s9 + $0xf8] sm:$0xff] %v1274_v1  ;;  %v3121_v19 = vrot.slane %v2336_v51, 4 }
 0x10f   : > { %v505_v40 = vsel %vm329_vm0, %v3118_v37, %v3117_v6  ;;  %v506_v32 = vsel %vm330_vm7, %v3120_v24, %v3119_v58  ;;  %v1255_v42 = vmul.f32 %v1238_v17, %v499_v34  ;;  %v1256_v56 = vmul.f32 %v1238_v17, %v500_v55  ;;  %1324 = vst [vmem:[%s2436_s9 + $0x100] sm:$0xff] %v1275_v21 }
 0x110   : > { %v1257_v18 = vmul.f32 %v1238_v17, %v501_v59  ;;  %v1258_v29 = vmul.f32 %v1238_v17, %v502_v8  ;;  %v1259_v53 = vmul.f32 %v1238_v17, %v503_v12  ;;  %v1260_v6 = vmul.f32 %v1238_v17, %v504_v11  ;;  %1325 = vst [vmem:[%s2436_s9 + $0x108] sm:$0xff] %v1276_v25  ;;  %v1201_v12 = vpop.permute.xlu1 %1200 }
 0x111   : > { %v1261_v37 = vmul.f32 %v1238_v17, %v505_v40  ;;  %v1262_v7 = vmul.f32 %v1238_v17, %v506_v32  ;;  %v1263_v4 = vmul.f32 %v1238_v17, %v2407_v54  ;;  %v1264_v44 = vmul.f32 %v1238_v17, %v2412_v33  ;;  %1326 = vst [vmem:[%s2436_s9 + $0x110] sm:$0xff] %v1277_v63  ;;  %v1187_v11 = vpop.permute.xlu0 %1186 }
 0x112   : > { %v1265_v2 = vmul.f32 %v1238_v17, %v2414_v30  ;;  %v854_v49 = vsel %vm626_vm10, %v3121_v19, %v2110_v23  ;;  %v1225_v34 = vsel %vm1221_vm2, %v2466_v47, %v2537_v48  ;;  %v1232_v57 = vsel %vm1231_vm11, %v1227_v0, %v2471_v36  ;;  %1303 = vst [vmem:[%s2436_s9 + $0x60] sm:$0x7f] %v1255_v42 }
 0x113   : > { %v3122_v1 = vperm.slane %v2529_v22, 0  ;;  %v3123_v54 = vperm.slane %v2614_v20, 0  ;;  %v3124_v51 = vperm.slane %v2351_v15, 3  ;;  %v3125_v23 = vperm.slane %v2371_v60, 3  ;;  %1304 = vst [vmem:[%s2436_s9 + $0x68] sm:$0x7f] %v1256_v56 }
 0x114   : > { %v3126_v47 = vperm.slane %v2529_v22, 1  ;;  %v3127_v36 = vperm.slane %v2614_v20, 1  ;;  %v3128_v48 = vperm.slane %v2529_v22, 2  ;;  %v3129_v15 = vperm.slane %v2614_v20, 2  ;;  %1305 = vst [vmem:[%s2436_s9 + $0x70] sm:$0x7f] %v1257_v18 }
 0x115   : > { %v487_v33 = vsel %vm311_vm5, %v3123_v54, %v3122_v1  ;;  %v510_v30 = vsel %vm334_vm3, %v3125_v23, %v3124_v51  ;;  %vm3130_vm10 = vcmp.lt.s32.totalorder %v2482_v41, %v2373_v50  ;;  %v3131_v52 = vperm.slane %v2529_v22, 3  ;;  %1306 = vst [vmem:[%s2436_s9 + $0x78] sm:$0x7f] %v1258_v29 }
 0x116   : > { %v488_v21 = vsel %vm312_vm6, %v3127_v36, %v3126_v47  ;;  %v489_v60 = vsel %vm3130_vm10, %v3129_v15, %v3128_v48  ;;  %v3132_v25 = vperm.slane %v2614_v20, 3  ;;  %vm3133_vm2 = vcmp.lt.s32.totalorder %v2485_v35, %v2373_v50  ;;  %1307 = vst [vmem:[%s2436_s9 + $0x80] sm:$0x7f] %v1259_v53 }
 0x117   : > { %v3134_v55 = vperm.slane %v2529_v22, 4  ;;  %v3135_v59 = vperm.slane %v2614_v20, 4  ;;  %vm3136_vm5 = vcmp.lt.s32.totalorder %v2488_v45, %v2373_v50  ;;  %v3137_v38 = vperm.slane %v2529_v22, 5  ;;  %1308 = vst [vmem:[%s2436_s9 + $0x88] sm:$0x7f] %v1260_v6 }
 0x118   : > { %v490_v27 = vsel %vm3133_vm2, %v3132_v25, %v3131_v52  ;;  %v3138_v40 = vperm.slane %v2614_v20, 5  ;;  %vm3139_vm6 = vcmp.lt.s32.totalorder %v2496_v3, %v2373_v50  ;;  %v3140_v24 = vperm.slane %v2529_v22, 6  ;;  %1309 = vst [vmem:[%s2436_s9 + $0x90] sm:$0x7f] %v1261_v37 }
 0x119   : > { %v491_v8 = vsel %vm3136_vm5, %v3135_v59, %v3134_v55  ;;  %v3141_v32 = vperm.slane %v2614_v20, 6  ;;  %vm3142_vm3 = vcmp.lt.s32.totalorder %v2499_v28, %v2373_v50  ;;  %v3143_v17 = vperm.slane %v2529_v22, 7  ;;  %1310 = vst [vmem:[%s2436_s9 + $0x98] sm:$0x7f] %v1262_v7  ;;  %v1193_v13 = vpop.permute.xlu0 %1192 }
 0x11a   : > { %v492_v58 = vsel %vm3139_vm6, %v3138_v40, %v3137_v38  ;;  %v3144_v63 = vperm.slane %v2614_v20, 7  ;;  %vm3145_vm10 = vcmp.lt.s32.totalorder %v2506_v31, %v2373_v50  ;;  %v1241_v1 = vsel %vm1206_vm15, %v854_v49, %v1201_v12  ;;  %1311 = vst [vmem:[%s2436_s9 + $0xa0] sm:$0x7f] %v1263_v4  ;;  %v3164_v40 = vld [vmem:[#allocation8_spill] sm:$0xff] }
 0x11b   : > { %v493_v0 = vsel %vm3142_vm3, %v3141_v32, %v3140_v24  ;;  %v1230_v54 = vsel %vm1226_vm4, %v1225_v34, %v2531_v26  ;;  %v1237_v51 = vsel %vm1236_vm1, %v1232_v57, %v1187_v11  ;;  %v1266_v23 = vmul.f32 %v1241_v1, %v510_v30  ;;  %1312 = vst [vmem:[%s2436_s9 + $0xa8] sm:$0x7f] %v1264_v44  ;;  %v3163_v11 = vld [vmem:[#allocation7_spill] sm:$0xff] }
 0x11c   : > { %v494_v19 = vsel %vm3145_vm10, %v3144_v63, %v3143_v17  ;;  %v1243_v22 = vmul.f32 %v1237_v51, %v487_v33  ;;  %v1244_v20 = vmul.f32 %v1237_v51, %v488_v21  ;;  %v1245_v47 = vmul.f32 %v1237_v51, %v489_v60  ;;  %1313 = vst [vmem:[%s2436_s9 + $0xb0] sm:$0x7f] %v1265_v2 }
 0x11d   : > { %v1246_v36 = vmul.f32 %v1237_v51, %v490_v27  ;;  %v1247_v50 = vmul.f32 %v1237_v51, %v491_v8  ;;  %v1248_v48 = vmul.f32 %v1237_v51, %v492_v58  ;;  %v1249_v49 = vmul.f32 %v1237_v51, %v493_v0 }
 0x11e   : > { %v1250_v15 = vmul.f32 %v1237_v51, %v494_v19  ;;  %v1251_v26 = vmul.f32 %v1237_v51, %v2401_v62  ;;  %v1252_v42 = vmul.f32 %v1237_v51, %v2403_v39  ;;  %v1253_v56 = vmul.f32 %v1237_v51, %v2405_v10  ;;  %1291 = vst [vmem:[%s2436_s9] sm:$0xff] %v1243_v22  ;;  %v1384_v51 = vld [vmem:[%s2436_s9 + $0x58] sm:$0xff] (%p1720_p5)  ;;  %v1388_v22 = vld [vmem:[%s2436_s9 + $0x68] sm:$0xff] (%p1720_p5) }
 0x11f   : > { %v1235_v34 = vsel %vm1231_vm11, %v1230_v54, %v2519_v61  ;;  %v3146_v18 = vperm.slane %v2469_v43, 0  ;;  %v3147_v57 = vperm.slane %v2502_v5, 0  ;;  %vm3148_vm15 = vcmp.lt.s32.totalorder %v2354_v9, %v2381_v14  ;;  %1292 = vst [vmem:[%s2436_s9 + $0x8] sm:$0xff] %v1244_v20  ;;  %v1390_v20 = vld [vmem:[%s2436_s9 + $0x70] sm:$0xff] (%p1720_p5) }
 0x120   : > { %v3149_v39 = vperm.slane %v2469_v43, 1  ;;  %v3150_v29 = vperm.slane %v2502_v5, 1  ;;  %v3151_v61 = vperm.slane %v2469_v43, 2  ;;  %v3152_v53 = vperm.slane %v2502_v5, 2  ;;  %1293 = vst [vmem:[%s2436_s9 + $0x10] sm:$0xff] %v1245_v47  ;;  %v1392_v47 = vld [vmem:[%s2436_s9 + $0x78] sm:$0xff] (%p1720_p5) }
 0x121   : > { %v523_v62 = vsel %vm3148_vm15, %v3147_v57, %v3146_v18  ;;  %v3153_v9 = vperm.slane %v2469_v43, 3  ;;  %v3154_v37 = vperm.slane %v2502_v5, 3  ;;  %v3155_v30 = vperm.slane %v2469_v43, 4  ;;  %1294 = vst [vmem:[%s2436_s9 + $0x18] sm:$0xff] %v1246_v36  ;;  %v1394_v36 = vld [vmem:[%s2436_s9 + $0x80] sm:$0xff] (%p1720_p5)  ;;  %v1412_v18 = vld [vmem:[%s2436_s9 + $0xc8] sm:$0xff] (%p1720_p5) }
 0x122   : > { %v524_v10 = vsel %vm324_vm12, %v3150_v29, %v3149_v39  ;;  %v525_v6 = vsel %vm325_vm13, %v3152_v53, %v3151_v61  ;;  %v3156_v21 = vperm.slane %v2502_v5, 4  ;;  %v3157_v60 = vperm.slane %v2469_v43, 5  ;;  %1295 = vst [vmem:[%s2436_s9 + $0x20] sm:$0xff] %v1247_v50  ;;  %v1396_v50 = vld [vmem:[%s2436_s9 + $0x88] sm:$0xff] (%p1720_p5)  ;;  %v1414_v57 = vld [vmem:[%s2436_s9 + $0xd0] sm:$0xff] (%p1720_p5)  ;;  %v1418_v39 = vld [vmem:[%s2436_s9 + $0xe0] sm:$0xff] (%p1720_p5) }
 0x123   : > { %v526_v33 = vsel %vm326_vm9, %v3154_v37, %v3153_v9  ;;  %v3158_v52 = vperm.slane %v2502_v5, 5  ;;  %v3159_v7 = vperm.slane %v2469_v43, 6  ;;  %v3160_v25 = vperm.slane %v2502_v5, 6  ;;  %1296 = vst [vmem:[%s2436_s9 + $0x28] sm:$0xff] %v1248_v48  ;;  %v1398_v48 = vld [vmem:[%s2436_s9 + $0x90] sm:$0xff] (%p1720_p5)  ;;  %v1420_v29 = vld [vmem:[%s2436_s9 + $0xe8] sm:$0xff] (%p1720_p5) }
 0x124   : > { %v527_v41 = vsel %vm327_vm8, %v3156_v21, %v3155_v30  ;;  %v3161_v45 = vperm.slane %v2469_v43, 7  ;;  %v3162_v55 = vperm.slane %v2502_v5, 7  ;;  %v1240_v3 = vsel %vm1236_vm1, %v1235_v34, %v1193_v13  ;;  %1297 = vst [vmem:[%s2436_s9 + $0x30] sm:$0xff] %v1249_v49  ;;  %v1400_v49 = vld [vmem:[%s2436_s9 + $0x98] sm:$0xff] (%p1720_p5)  ;;  %v1410_v34 = vld [vmem:[%s2436_s9 + $0xc0] sm:$0xff] (%p1720_p5)  ;;  %v1430_v9 = vld [vmem:[%s2436_s9 + $0x110] sm:$0xff] (%p1720_p5) }
 0x125   : > { %v528_v35 = vsel %vm328_vm14, %v3158_v52, %v3157_v60  ;;  %v529_v27 = vsel %vm329_vm0, %v3160_v25, %v3159_v7  ;;  %v1279_v8 = vmul.f32 %v1240_v3, %v523_v62  ;;  %v1280_v12 = vmul.f32 %v1240_v3, %v524_v10  ;;  %1298 = vst [vmem:[%s2436_s9 + $0x38] sm:$0xff] %v1250_v15  ;;  %v1402_v15 = vld [vmem:[%s2436_s9 + $0xa0] sm:$0xff] (%p1720_p5)  ;;  %v1416_v62 = vld [vmem:[%s2436_s9 + $0xd8] sm:$0xff] (%p1720_p5)  ;;  %v1422_v10 = vld [vmem:[%s2436_s9 + $0xf0] sm:$0xff] (%p1720_p5) }
 0x126   : > { %v530_v59 = vsel %vm330_vm7, %v3162_v55, %v3161_v45  ;;  %v1281_v28 = vmul.f32 %v1240_v3, %v525_v6  ;;  %v1282_v43 = vmul.f32 %v1240_v3, %v526_v33  ;;  %v1283_v5 = vmul.f32 %v1240_v3, %v527_v41  ;;  %1299 = vst [vmem:[%s2436_s9 + $0x40] sm:$0xff] %v1251_v26  ;;  %v1404_v26 = vld [vmem:[%s2436_s9 + $0xa8] sm:$0xff] (%p1720_p5)  ;;  %v1424_v61 = vld [vmem:[%s2436_s9 + $0xf8] sm:$0xff] (%p1720_p5)  ;;  %v1426_v53 = vld [vmem:[%s2436_s9 + $0x100] sm:$0xff] (%p1720_p5) }
 0x127   : > { %v1284_v14 = vmul.f32 %v1240_v3, %v528_v35  ;;  %v1285_v31 = vmul.f32 %v1240_v3, %v529_v27  ;;  %v1286_v4 = vmul.f32 %v1240_v3, %v530_v59  ;;  %v1287_v44 = vmul.f32 %v1240_v3, %v2395_v16  ;;  %1300 = vst [vmem:[%s2436_s9 + $0x48] sm:$0xff] %v1252_v42  ;;  %v1362_v16 = vld [vmem:[%s2436_s9] sm:$0xff] (%p1720_p5)  ;;  %v1366_v2 = vld [vmem:[%s2436_s9 + $0x10] sm:$0xff] (%p1720_p5)  ;;  %v1428_v6 = vld [vmem:[%s2436_s9 + $0x108] sm:$0xff] (%p1720_p5) }
 0x128   : > { %v1288_v38 = vmul.f32 %v1240_v3, %v3163_v11  ;;  %v1289_v58 = vmul.f32 %v1240_v3, %v3164_v40  ;;  %vm1314_vm4 = vcmask 260096   ;;  %1301 = vst [vmem:[%s2436_s9 + $0x50] sm:$0xff] %v1253_v56  ;;  %v1368_v24 = vld [vmem:[%s2436_s9 + $0x18] sm:$0xff] (%p1720_p5)  ;;  %v1406_v42 = vld [vmem:[%s2436_s9 + $0xb0] sm:$0xff] (%p1720_p5) }
 0x129   : > { %1315 = vst.msk [vmem:[%s2436_s9 + $0xb8] sm:$0x7f] %vm1314_vm4, %v1266_v23  ;;  %v1370_v32 = vld [vmem:[%s2436_s9 + $0x20] sm:$0xff] (%p1720_p5)  ;;  %v1432_v37 = vld [vmem:[%s2436_s9 + $0x118] sm:$0xff] (%p1720_p5) }
 0x12a   : > { %1339 = vst.msk [vmem:[%s2436_s9 + $0x178] sm:$0x7f] %vm1314_vm4, %v2731_v46  ;;  %v1364_v46 = vld [vmem:[%s2436_s9 + $0x8] sm:$0xff] (%p1720_p5)  ;;  %v1386_v23 = vld [vmem:[%s2436_s9 + $0x60] sm:$0xff] (%p1720_p5) }
 0x12b   : > { %1328 = vst [vmem:[%s2436_s9 + $0x120] sm:$0x7f] %v1279_v8  ;;  %v1372_v0 = vld [vmem:[%s2436_s9 + $0x28] sm:$0xff] (%p1720_p5)  ;;  %v1374_v17 = vld [vmem:[%s2436_s9 + $0x30] sm:$0xff] (%p1720_p5) }
 0x12c   : > { %1329 = vst [vmem:[%s2436_s9 + $0x128] sm:$0x7f] %v1280_v12  ;;  %v1376_v63 = vld [vmem:[%s2436_s9 + $0x38] sm:$0xff] (%p1720_p5) }
 0x12d   : > { %1330 = vst [vmem:[%s2436_s9 + $0x130] sm:$0x7f] %v1281_v28  ;;  %v1378_v19 = vld [vmem:[%s2436_s9 + $0x40] sm:$0xff] (%p1720_p5) }
 0x12e   : > { %1331 = vst [vmem:[%s2436_s9 + $0x138] sm:$0x7f] %v1282_v43  ;;  %v1380_v1 = vld [vmem:[%s2436_s9 + $0x48] sm:$0xff] (%p1720_p5) }
 0x12f   : > { %1332 = vst [vmem:[%s2436_s9 + $0x140] sm:$0x7f] %v1283_v5  ;;  %v1382_v54 = vld [vmem:[%s2436_s9 + $0x50] sm:$0xff] (%p1720_p5) }
 0x130   : > { %1333 = vst [vmem:[%s2436_s9 + $0x148] sm:$0x7f] %v1284_v14  ;;  %v1408_v56 = vld [vmem:[%s2436_s9 + $0xb8] sm:$0xff] (%p1720_p5) }
 0x131   : > { %1334 = vst [vmem:[%s2436_s9 + $0x150] sm:$0x7f] %v1285_v31  ;;  %1346 = sbr.rel (!%p1720_p5) target bundleno = 358 (0x166), region = 74  ;;  %v1456_v45 = vld [vmem:[%s2436_s9 + $0x178] sm:$0xff] (%p1720_p5) }
 0x132   : > { %1335 = vst [vmem:[%s2436_s9 + $0x158] sm:$0x7f] %v1286_v4  ;;  %v1434_v33 = vld [vmem:[%s2436_s9 + $0x120] sm:$0xff] (%p1720_p5) }
 0x133   : > { %1336 = vst [vmem:[%s2436_s9 + $0x160] sm:$0x7f] %v1287_v44  ;;  %v1436_v13 = vld [vmem:[%s2436_s9 + $0x128] sm:$0xff] (%p1720_p5) }
 0x134   : > { %1337 = vst [vmem:[%s2436_s9 + $0x168] sm:$0x7f] %v1288_v38  ;;  %v1438_v30 = vld [vmem:[%s2436_s9 + $0x130] sm:$0xff] (%p1720_p5) }
 0x135   : > { %1338 = vst [vmem:[%s2436_s9 + $0x170] sm:$0x7f] %v1289_v58  ;;  %v1440_v21 = vld [vmem:[%s2436_s9 + $0x138] sm:$0xff] (%p1720_p5) }
 0x136   : > { %1363 = vst [vmem:[%s2932_s27] sm:$0xff] %v1362_v16  ;;  %v1442_v41 = vld [vmem:[%s2436_s9 + $0x140] sm:$0xff] }
 0x137   : > { %1365 = vst [vmem:[%s2932_s27 + $0x8] sm:$0xff] %v1364_v46  ;;  %v1444_v60 = vld [vmem:[%s2436_s9 + $0x148] sm:$0xff] }
 0x138   : > { %1367 = vst [vmem:[%s2932_s27 + $0x10] sm:$0xff] %v1366_v2  ;;  %v1446_v52 = vld [vmem:[%s2436_s9 + $0x150] sm:$0xff] }
 0x139   : > { %1369 = vst [vmem:[%s2932_s27 + $0x18] sm:$0xff] %v1368_v24  ;;  %v1448_v35 = vld [vmem:[%s2436_s9 + $0x158] sm:$0xff] }
 0x13a   : > { %1371 = vst [vmem:[%s2932_s27 + $0x20] sm:$0xff] %v1370_v32  ;;  %v1450_v7 = vld [vmem:[%s2436_s9 + $0x160] sm:$0xff] }
 0x13b   : > { %1373 = vst [vmem:[%s2932_s27 + $0x28] sm:$0xff] %v1372_v0  ;;  %v1452_v25 = vld [vmem:[%s2436_s9 + $0x168] sm:$0xff] }
 0x13c   : > { %1375 = vst [vmem:[%s2932_s27 + $0x30] sm:$0xff] %v1374_v17  ;;  %v1454_v27 = vld [vmem:[%s2436_s9 + $0x170] sm:$0xff] }
 0x13d   : > { %1377 = vst [vmem:[%s2932_s27 + $0x38] sm:$0xff] %v1376_v63 }
 0x13e   : > { %1379 = vst [vmem:[%s2932_s27 + $0x40] sm:$0xff] %v1378_v19 }
 0x13f   : > { %1381 = vst [vmem:[%s2932_s27 + $0x48] sm:$0xff] %v1380_v1 }
 0x140   : > { %1383 = vst [vmem:[%s2932_s27 + $0x50] sm:$0xff] %v1382_v54 }
 0x141   : > { %1385 = vst [vmem:[%s2932_s27 + $0x58] sm:$0xff] %v1384_v51 }
 0x142   : > { %1387 = vst [vmem:[%s2932_s27 + $0x60] sm:$0xff] %v1386_v23 }
 0x143   : > { %1389 = vst [vmem:[%s2932_s27 + $0x68] sm:$0xff] %v1388_v22 }
 0x144   : > { %1391 = vst [vmem:[%s2932_s27 + $0x70] sm:$0xff] %v1390_v20 }
 0x145   : > { %1393 = vst [vmem:[%s2932_s27 + $0x78] sm:$0xff] %v1392_v47 }
 0x146   : > { %1395 = vst [vmem:[%s2932_s27 + $0x80] sm:$0xff] %v1394_v36 }
 0x147   : > { %1397 = vst [vmem:[%s2932_s27 + $0x88] sm:$0xff] %v1396_v50 }
 0x148   : > { %1399 = vst [vmem:[%s2932_s27 + $0x90] sm:$0xff] %v1398_v48 }
 0x149   : > { %1401 = vst [vmem:[%s2932_s27 + $0x98] sm:$0xff] %v1400_v49 }
 0x14a   : > { %1403 = vst [vmem:[%s2932_s27 + $0xa0] sm:$0xff] %v1402_v15 }
 0x14b   : > { %1405 = vst [vmem:[%s2932_s27 + $0xa8] sm:$0xff] %v1404_v26 }
 0x14c   : > { %1407 = vst [vmem:[%s2932_s27 + $0xb0] sm:$0xff] %v1406_v42 }
 0x14d   : > { %1409 = vst [vmem:[%s2932_s27 + $0xb8] sm:$0xff] %v1408_v56 }
 0x14e   : > { %1411 = vst [vmem:[%s2932_s27 + $0x480] sm:$0xff] %v1410_v34 }
 0x14f   : > { %1413 = vst [vmem:[%s2932_s27 + $0x488] sm:$0xff] %v1412_v18 }
 0x150   : > { %1415 = vst [vmem:[%s2932_s27 + $0x490] sm:$0xff] %v1414_v57 }
 0x151   : > { %1417 = vst [vmem:[%s2932_s27 + $0x498] sm:$0xff] %v1416_v62 }
 0x152   : > { %1419 = vst [vmem:[%s2932_s27 + $0x4a0] sm:$0xff] %v1418_v39 }
 0x153   : > { %1421 = vst [vmem:[%s2932_s27 + $0x4a8] sm:$0xff] %v1420_v29 }
 0x154   : > { %1423 = vst [vmem:[%s2932_s27 + $0x4b0] sm:$0xff] %v1422_v10 }
 0x155   : > { %1425 = vst [vmem:[%s2932_s27 + $0x4b8] sm:$0xff] %v1424_v61 }
 0x156   : > { %1427 = vst [vmem:[%s2932_s27 + $0x4c0] sm:$0xff] %v1426_v53 }
 0x157   : > { %1429 = vst [vmem:[%s2932_s27 + $0x4c8] sm:$0xff] %v1428_v6 }
 0x158   : > { %1431 = vst [vmem:[%s2932_s27 + $0x4d0] sm:$0xff] %v1430_v9 }
 0x159   : > { %1433 = vst [vmem:[%s2932_s27 + $0x4d8] sm:$0xff] %v1432_v37 }
 0x15a   : > { %1435 = vst [vmem:[%s2932_s27 + $0x4e0] sm:$0xff] %v1434_v33 }
 0x15b   : > { %1437 = vst [vmem:[%s2932_s27 + $0x4e8] sm:$0xff] %v1436_v13 }
 0x15c   : > { %1439 = vst [vmem:[%s2932_s27 + $0x4f0] sm:$0xff] %v1438_v30 }
 0x15d   : > { %1441 = vst [vmem:[%s2932_s27 + $0x4f8] sm:$0xff] %v1440_v21 }
 0x15e   : > { %1443 = vst [vmem:[%s2932_s27 + $0x500] sm:$0xff] %v1442_v41 }
 0x15f   : > { %1445 = vst [vmem:[%s2932_s27 + $0x508] sm:$0xff] %v1444_v60 }
 0x160   : > { %1447 = vst [vmem:[%s2932_s27 + $0x510] sm:$0xff] %v1446_v52 }
 0x161   : > { %1449 = vst [vmem:[%s2932_s27 + $0x518] sm:$0xff] %v1448_v35 }
 0x162   : > { %1451 = vst [vmem:[%s2932_s27 + $0x520] sm:$0xff] %v1450_v7 }
 0x163   : > { %1453 = vst [vmem:[%s2932_s27 + $0x528] sm:$0xff] %v1452_v25 }
 0x164   : > { %1455 = vst [vmem:[%s2932_s27 + $0x530] sm:$0xff] %v1454_v27 }
 0x165   : > { %1457 = vst [vmem:[%s2932_s27 + $0x538] sm:$0xff] %v1456_v45 }
 0x166 PF: > { %p10_p13 = scmp.ge.s32.totalorder %s1704_s13, 8   ;;  %s3165_s9 = smov %s1652_s10 }
 0x167   : > { %s3166_s10 = smov %s1714_s16  ;;  %s3167_s11 = smov %s1704_s13 }
 0x168   :  { %12 = sbr.rel (!%p10_p13) target bundleno = 2 (0x2), region = 129 }
 0x16d   :  { %1473 = vsyncpa [#allocation3], 1 }
 0x16e   :  { %1475 = vsyncpa [#allocation3 + $0x1], 1 }

</bundles_post_ra>
